<compile_context>
chip_gen: v7x
topology: tpu7x:2x2x1
jax: 0.10.0
libtpu: 0.0.40
codegen_flags: <defaults>
</compile_context>

<pallas_src>
import jax
import jax.numpy as jnp
from jax.experimental import pallas as pl
from jax.experimental.pallas import tpu as pltpu


def _residual_stack_kernel(x_ref, w3_ref, w1_ref, o_ref, pad_ref):
    # x_ref  : (bt*H, W*C)        f32, bt images in lane-dense layout
    # w3_ref : (L, 3, W*C, W*Ch)  bf16, banded 3x3-conv weights (one per dy tap)
    # w1_ref : (L, W*Ch, W*C)     bf16, block-diagonal 1x1-conv weights
    # o_ref  : (bt*H, W*C)        f32, written once at the end
    # pad_ref: (bt, H+2, W*C)     f32 scratch; rows 0 and H+1 are the zero halo
    bt, hp2, wc = pad_ref.shape
    h_rows = hp2 - 2
    n = bt * h_rows
    num_layers = w3_ref.shape[0]

    # Zero only the halo rows (top + bottom of every image in the chunk). The
    # interior is fully rewritten each layer, so the halo stays zero afterwards.
    pad_ref[:, pl.ds(0, 1), :] = jnp.zeros((bt, 1, wc), jnp.float32)
    pad_ref[:, pl.ds(h_rows + 1, 1), :] = jnp.zeros((bt, 1, wc), jnp.float32)

    x = x_ref[...]                                   # running activation, (n, wc) f32
    for l in range(num_layers):                      # static unroll; L is small
        act = jnp.maximum(x, 0.0)                    # first ReLU (full-width lanes)
        pad_ref[:, pl.ds(1, h_rows), :] = act.reshape(bt, h_rows, wc)

        # 3x3 SAME conv == 3 banded matmuls (one per dy tap), f32 accumulation.
        acc = None
        for dy in range(3):
            tap = pad_ref[:, pl.ds(dy, h_rows), :].reshape(n, wc)
            part = jnp.dot(tap.astype(jnp.bfloat16), w3_ref[l, dy],
                           preferred_element_type=jnp.float32)   # (n, W*Ch)
            acc = part if acc is None else acc + part
        acc = jnp.maximum(acc, 0.0)                  # second ReLU

        # 1x1 conv == block-diagonal matmul back to (n, W*C).
        out = jnp.dot(acc.astype(jnp.bfloat16), w1_ref[l],
                      preferred_element_type=jnp.float32)
        x = x + out                                  # residual add

    # Final ReLU of the stack; single full-width store of the output block.
    o_ref[...] = jnp.maximum(x, 0.0).astype(o_ref.dtype)


def _banded_conv3x3_weights(w3_hwio, W):
    """(L, 3, 3, C, Ch) HWIO weights -> (L, 3, W*C, W*Ch) lane-domain banded mats."""
    L, _, _, C, Ch = w3_hwio.shape
    x_idx = jnp.arange(W)[:, None, None]        # output column x
    dx_idx = jnp.arange(3)[None, :, None]       # kernel tap dx
    q_idx = jnp.arange(W)[None, None, :]        # input column xq (L/R padding dropped)
    sel = (q_idx == x_idx + dx_idx - 1).astype(w3_hwio.dtype)        # (W, 3, W)
    # Mw[l, dy, q*C + ci, x*Ch + co] = w3[l, dy, q - x + 1, ci, co] (0 outside band)
    mw = jnp.einsum("xdq,lydio->lyqixo", sel, w3_hwio)
    return mw.reshape(L, 3, W * C, W * Ch)


def _blockdiag_conv1x1_weights(w1, W):
    """(L, Ch, C) 1x1-conv weights -> (L, W*Ch, W*C) block-diagonal matrices."""
    L, Ch, C = w1.shape
    eye = jnp.eye(W, dtype=w1.dtype)
    m1 = jnp.einsum("xz,loc->lxozc", eye, w1)
    return m1.reshape(L, W * Ch, W * C)


def residual_stack_forward(x_nchw, w3_hwio, w1):
    """x_nchw: (B, C, H, W) f32; w3_hwio: (L, 3, 3, C, Ch); w1: (L, Ch, C)."""
    B, C, H, W = x_nchw.shape
    L, _, _, _, Ch = w3_hwio.shape

    # >=2 parallel grid steps whenever possible (v7x has 2 TensorCores); each
    # step folds bt images into the matmul rows.
    if B >= 2 and B % 2 == 0:
        num_steps = 2
    else:
        num_steps = B
    bt = B // num_steps

    # Lane-dense activation layout: (B*H, W*C); W*C = 512 lanes at the demo size.
    x2 = jnp.transpose(x_nchw, (0, 2, 3, 1)).astype(jnp.float32).reshape(B * H, W * C)

    # Host-side weight prep: lane-domain banded / block-diagonal matrices, bf16.
    w3k = _banded_conv3x3_weights(w3_hwio.astype(jnp.float32), W).astype(jnp.bfloat16)
    w1k = _blockdiag_conv1x1_weights(w1.astype(jnp.float32), W).astype(jnp.bfloat16)

    out2 = pl.pallas_call(
        _residual_stack_kernel,
        out_shape=jax.ShapeDtypeStruct((B * H, W * C), jnp.float32),
        grid_spec=pltpu.PrefetchScalarGridSpec(
            num_scalar_prefetch=0,
            grid=(num_steps,),
            in_specs=[
                pl.BlockSpec((bt * H, W * C), lambda b: (b, 0)),
                # Constant index maps -> weights fetched once and stay resident.
                pl.BlockSpec((L, 3, W * C, W * Ch), lambda b: (0, 0, 0, 0)),
                pl.BlockSpec((L, W * Ch, W * C), lambda b: (0, 0, 0)),
            ],
            out_specs=pl.BlockSpec((bt * H, W * C), lambda b: (b, 0)),
            scratch_shapes=[
                pltpu.VMEM((bt, H + 2, W * C), jnp.float32),
            ],
        ),
        compiler_params=pltpu.CompilerParams(
            dimension_semantics=("parallel",),
            vmem_limit_bytes=32 * 1024 * 1024,   # explicit budget; actual use ~4 MiB
        ),
    )(x2, w3k, w1k)

    out = out2.reshape(B, H, W, C)
    return jnp.transpose(out, (0, 3, 1, 2))      # back to NCHW


def residual_stack_reference(x_nchw, w3_hwio, w1):
    """Pure-JAX reference matching the PyTorch module semantics."""
    x = jnp.transpose(x_nchw, (0, 2, 3, 1)).astype(jnp.float32)
    L = w3_hwio.shape[0]
    for l in range(L):
        h = jax.nn.relu(x)
        h = jax.lax.conv_general_dilated(
            h, w3_hwio[l], window_strides=(1, 1), padding="SAME",
            dimension_numbers=("NHWC", "HWIO", "NHWC"))
        h = jax.nn.relu(h)
        h = jnp.einsum("bhwf,fc->bhwc", h, w1[l])
        x = x + h
    x = jax.nn.relu(x)
    return jnp.transpose(x, (0, 3, 1, 2))


if __name__ == "__main__":
    # ResidualStack(in_channels=32, num_hiddens=32, num_residual_layers=2,
    #               num_residual_hiddens=16)
    B, C, H, W = 2, 32, 16, 16     # NCHW input, in_channels == num_hiddens
    L, Ch = 2, 16                  # num_residual_layers, num_residual_hiddens

    key = jax.random.PRNGKey(0)
    kx, k3, k1 = jax.random.split(key, 3)
    x_nchw = jax.random.normal(kx, (B, C, H, W), dtype=jnp.float32)
    # Conv2d(in=C, out=Ch, k=3, pad=1, bias=False) weights, stored HWIO per layer
    w3_hwio = 0.1 * jax.random.normal(k3, (L, 3, 3, C, Ch), dtype=jnp.float32)
    # Conv2d(in=Ch, out=C, k=1, bias=False) weights as (Ch, C) matmul per layer
    w1 = 0.1 * jax.random.normal(k1, (L, Ch, C), dtype=jnp.float32)

    out = residual_stack_forward(x_nchw, w3_hwio, w1)
    out = jax.block_until_ready(out)

    ref = residual_stack_reference(x_nchw, w3_hwio, w1)
    ref = jax.block_until_ready(ref)
    assert out.shape == ref.shape == (B, C, H, W)
    # bf16 matmul operands with f32 accumulation -> looser tolerance than pure f32.
    assert jnp.allclose(out, ref, atol=5e-2, rtol=5e-2), "mismatch vs reference"

    print("KERNEL_OK")
</pallas_src>

<mosaic_0001>
module attributes {stable_mosaic.version = 11 : i64} {
  func.func @_residual_stack_kernel(%arg0: i32, %arg1: memref<16x512xf32, #tpu.memory_space<vmem>>, %arg2: memref<2x3x512x256xbf16, #tpu.memory_space<vmem>>, %arg3: memref<2x256x512xbf16, #tpu.memory_space<vmem>>, %arg4: memref<16x512xf32, #tpu.memory_space<vmem>>, %arg5: memref<1x18x512xf32, #tpu.memory_space<vmem>>) attributes {dimension_semantics = [#tpu.dimension_semantics<parallel>], iteration_bounds = array<i64: 2>, scalar_prefetch = 0 : i64, scratch_operands = 1 : i64, tpu.core_type = #tpu.core_type<tc>, window_params = [{transform_indices = @transform_0, window_bounds = array<i64: 16, 512>}, {pipeline_mode = #tpu.pipeline_mode<synchronous>, transform_indices = @transform_1, window_bounds = array<i64: 2, 3, 512, 256>}, {pipeline_mode = #tpu.pipeline_mode<synchronous>, transform_indices = @transform_2, window_bounds = array<i64: 2, 256, 512>}, {transform_indices = @transform_3, window_bounds = array<i64: 16, 512>}]} {
    %cst = arith.constant 0.000000e+00 : f32
    %0 = vector.broadcast %cst : f32 to vector<1x1x512xf32>
    %c0 = arith.constant 0 : index
    %c0_0 = arith.constant 0 : index
    %c0_1 = arith.constant 0 : index
    %1 = vector.load %arg5[%c0, %c0_0, %c0_1] : memref<1x18x512xf32, #tpu.memory_space<vmem>>, vector<1x1x512xf32>
    tpu.vector_store %arg5[%c0, %c0_0, %c0_1], %0 {strides = array<i32>} : memref<1x18x512xf32, #tpu.memory_space<vmem>>, vector<1x1x512xf32>,
    %cst_2 = arith.constant 0.000000e+00 : f32
    %2 = vector.broadcast %cst_2 : f32 to vector<1x1x512xf32>
    %c0_3 = arith.constant 0 : index
    %c17 = arith.constant 17 : index
    %c0_4 = arith.constant 0 : index
    %3 = vector.load %arg5[%c0_3, %c17, %c0_4] : memref<1x18x512xf32, #tpu.memory_space<vmem>>, vector<1x1x512xf32>
    tpu.vector_store %arg5[%c0_3, %c17, %c0_4], %2 {strides = array<i32>} : memref<1x18x512xf32, #tpu.memory_space<vmem>>, vector<1x1x512xf32>,
    %c0_5 = arith.constant 0 : index
    %c0_6 = arith.constant 0 : index
    %4 = vector.load %arg1[%c0_5, %c0_6] : memref<16x512xf32, #tpu.memory_space<vmem>>, vector<16x512xf32>
    %cst_7 = arith.constant 0.000000e+00 : f32
    %5 = vector.broadcast %cst_7 : f32 to vector<16x512xf32>
    %6 = arith.maximumf %4, %5 : vector<16x512xf32>
    %7 = vector.shape_cast %6 : vector<16x512xf32> to vector<1x16x512xf32>
    %c0_8 = arith.constant 0 : index
    %c1 = arith.constant 1 : index
    %c0_9 = arith.constant 0 : index
    %8 = vector.load %arg5[%c0_8, %c1, %c0_9] : memref<1x18x512xf32, #tpu.memory_space<vmem>>, vector<1x16x512xf32>
    tpu.vector_store %arg5[%c0_8, %c1, %c0_9], %7 {strides = array<i32>} : memref<1x18x512xf32, #tpu.memory_space<vmem>>, vector<1x16x512xf32>,
    %c0_10 = arith.constant 0 : index
    %c0_11 = arith.constant 0 : index
    %c0_12 = arith.constant 0 : index
    %9 = vector.load %arg5[%c0_10, %c0_11, %c0_12] : memref<1x18x512xf32, #tpu.memory_space<vmem>>, vector<1x16x512xf32>
    %10 = vector.shape_cast %9 : vector<1x16x512xf32> to vector<16x512xf32>
    %11 = arith.truncf %10 : vector<16x512xf32> to vector<16x512xbf16>
    %c0_13 = arith.constant 0 : index
    %c0_14 = arith.constant 0 : index
    %c0_15 = arith.constant 0 : index
    %c0_16 = arith.constant 0 : index
    %12 = vector.load %arg2[%c0_13, %c0_14, %c0_15, %c0_16] : memref<2x3x512x256xbf16, #tpu.memory_space<vmem>>, vector<1x1x512x256xbf16>
    %13 = vector.shape_cast %12 : vector<1x1x512x256xbf16> to vector<512x256xbf16>
    %cst_17 = arith.constant dense<0.000000e+00> : vector<16x256xf32>
    %14 = tpu.matmul %11, %13, %cst_17 {dimension_numbers = #tpu.dot_dimension_numbers<[1], [0], [0], [1], [0, 0, 1, 1], [], []>} : vector<16x512xbf16>, vector<512x256xbf16>, vector<16x256xf32> -> vector<16x256xf32>
    %c0_18 = arith.constant 0 : index
    %c1_19 = arith.constant 1 : index
    %c0_20 = arith.constant 0 : index
    %15 = vector.load %arg5[%c0_18, %c1_19, %c0_20] : memref<1x18x512xf32, #tpu.memory_space<vmem>>, vector<1x16x512xf32>
    %16 = vector.shape_cast %15 : vector<1x16x512xf32> to vector<16x512xf32>
    %17 = arith.truncf %16 : vector<16x512xf32> to vector<16x512xbf16>
    %c0_21 = arith.constant 0 : index
    %c1_22 = arith.constant 1 : index
    %c0_23 = arith.constant 0 : index
    %c0_24 = arith.constant 0 : index
    %18 = vector.load %arg2[%c0_21, %c1_22, %c0_23, %c0_24] : memref<2x3x512x256xbf16, #tpu.memory_space<vmem>>, vector<1x1x512x256xbf16>
    %19 = vector.shape_cast %18 : vector<1x1x512x256xbf16> to vector<512x256xbf16>
    %cst_25 = arith.constant dense<0.000000e+00> : vector<16x256xf32>
    %20 = tpu.matmul %17, %19, %cst_25 {dimension_numbers = #tpu.dot_dimension_numbers<[1], [0], [0], [1], [0, 0, 1, 1], [], []>} : vector<16x512xbf16>, vector<512x256xbf16>, vector<16x256xf32> -> vector<16x256xf32>
    %21 = arith.addf %14, %20 : vector<16x256xf32>
    %c0_26 = arith.constant 0 : index
    %c2 = arith.constant 2 : index
    %c0_27 = arith.constant 0 : index
    %22 = vector.load %arg5[%c0_26, %c2, %c0_27] : memref<1x18x512xf32, #tpu.memory_space<vmem>>, vector<1x16x512xf32>
    %23 = vector.shape_cast %22 : vector<1x16x512xf32> to vector<16x512xf32>
    %24 = arith.truncf %23 : vector<16x512xf32> to vector<16x512xbf16>
    %c0_28 = arith.constant 0 : index
    %c2_29 = arith.constant 2 : index
    %c0_30 = arith.constant 0 : index
    %c0_31 = arith.constant 0 : index
    %25 = vector.load %arg2[%c0_28, %c2_29, %c0_30, %c0_31] : memref<2x3x512x256xbf16, #tpu.memory_space<vmem>>, vector<1x1x512x256xbf16>
    %26 = vector.shape_cast %25 : vector<1x1x512x256xbf16> to vector<512x256xbf16>
    %cst_32 = arith.constant dense<0.000000e+00> : vector<16x256xf32>
    %27 = tpu.matmul %24, %26, %cst_32 {dimension_numbers = #tpu.dot_dimension_numbers<[1], [0], [0], [1], [0, 0, 1, 1], [], []>} : vector<16x512xbf16>, vector<512x256xbf16>, vector<16x256xf32> -> vector<16x256xf32>
    %28 = arith.addf %21, %27 : vector<16x256xf32>
    %cst_33 = arith.constant 0.000000e+00 : f32
    %29 = vector.broadcast %cst_33 : f32 to vector<16x256xf32>
    %30 = arith.maximumf %28, %29 : vector<16x256xf32>
    %31 = arith.truncf %30 : vector<16x256xf32> to vector<16x256xbf16>
    %c0_34 = arith.constant 0 : index
    %c0_35 = arith.constant 0 : index
    %c0_36 = arith.constant 0 : index
    %32 = vector.load %arg3[%c0_34, %c0_35, %c0_36] : memref<2x256x512xbf16, #tpu.memory_space<vmem>>, vector<1x256x512xbf16>
    %33 = vector.shape_cast %32 : vector<1x256x512xbf16> to vector<256x512xbf16>
    %cst_37 = arith.constant dense<0.000000e+00> : vector<16x512xf32>
    %34 = tpu.matmul %31, %33, %cst_37 {dimension_numbers = #tpu.dot_dimension_numbers<[1], [0], [0], [1], [0, 0, 1, 1], [], []>} : vector<16x256xbf16>, vector<256x512xbf16>, vector<16x512xf32> -> vector<16x512xf32>
    %35 = arith.addf %4, %34 : vector<16x512xf32>
    %cst_38 = arith.constant 0.000000e+00 : f32
    %36 = vector.broadcast %cst_38 : f32 to vector<16x512xf32>
    %37 = arith.maximumf %35, %36 : vector<16x512xf32>
    %38 = vector.shape_cast %37 : vector<16x512xf32> to vector<1x16x512xf32>
    %c0_39 = arith.constant 0 : index
    %c1_40 = arith.constant 1 : index
    %c0_41 = arith.constant 0 : index
    %39 = vector.load %arg5[%c0_39, %c1_40, %c0_41] : memref<1x18x512xf32, #tpu.memory_space<vmem>>, vector<1x16x512xf32>
    tpu.vector_store %arg5[%c0_39, %c1_40, %c0_41], %38 {strides = array<i32>} : memref<1x18x512xf32, #tpu.memory_space<vmem>>, vector<1x16x512xf32>,
    %c0_42 = arith.constant 0 : index
    %c0_43 = arith.constant 0 : index
    %c0_44 = arith.constant 0 : index
    %40 = vector.load %arg5[%c0_42, %c0_43, %c0_44] : memref<1x18x512xf32, #tpu.memory_space<vmem>>, vector<1x16x512xf32>
    %41 = vector.shape_cast %40 : vector<1x16x512xf32> to vector<16x512xf32>
    %42 = arith.truncf %41 : vector<16x512xf32> to vector<16x512xbf16>
    %c1_45 = arith.constant 1 : index
    %c0_46 = arith.constant 0 : index
    %c0_47 = arith.constant 0 : index
    %c0_48 = arith.constant 0 : index
    %43 = vector.load %arg2[%c1_45, %c0_46, %c0_47, %c0_48] : memref<2x3x512x256xbf16, #tpu.memory_space<vmem>>, vector<1x1x512x256xbf16>
    %44 = vector.shape_cast %43 : vector<1x1x512x256xbf16> to vector<512x256xbf16>
    %cst_49 = arith.constant dense<0.000000e+00> : vector<16x256xf32>
    %45 = tpu.matmul %42, %44, %cst_49 {dimension_numbers = #tpu.dot_dimension_numbers<[1], [0], [0], [1], [0, 0, 1, 1], [], []>} : vector<16x512xbf16>, vector<512x256xbf16>, vector<16x256xf32> -> vector<16x256xf32>
    %c0_50 = arith.constant 0 : index
    %c1_51 = arith.constant 1 : index
    %c0_52 = arith.constant 0 : index
    %46 = vector.load %arg5[%c0_50, %c1_51, %c0_52] : memref<1x18x512xf32, #tpu.memory_space<vmem>>, vector<1x16x512xf32>
    %47 = vector.shape_cast %46 : vector<1x16x512xf32> to vector<16x512xf32>
    %48 = arith.truncf %47 : vector<16x512xf32> to vector<16x512xbf16>
    %c1_53 = arith.constant 1 : index
    %c1_54 = arith.constant 1 : index
    %c0_55 = arith.constant 0 : index
    %c0_56 = arith.constant 0 : index
    %49 = vector.load %arg2[%c1_53, %c1_54, %c0_55, %c0_56] : memref<2x3x512x256xbf16, #tpu.memory_space<vmem>>, vector<1x1x512x256xbf16>
    %50 = vector.shape_cast %49 : vector<1x1x512x256xbf16> to vector<512x256xbf16>
    %cst_57 = arith.constant dense<0.000000e+00> : vector<16x256xf32>
    %51 = tpu.matmul %48, %50, %cst_57 {dimension_numbers = #tpu.dot_dimension_numbers<[1], [0], [0], [1], [0, 0, 1, 1], [], []>} : vector<16x512xbf16>, vector<512x256xbf16>, vector<16x256xf32> -> vector<16x256xf32>
    %52 = arith.addf %45, %51 : vector<16x256xf32>
    %c0_58 = arith.constant 0 : index
    %c2_59 = arith.constant 2 : index
    %c0_60 = arith.constant 0 : index
    %53 = vector.load %arg5[%c0_58, %c2_59, %c0_60] : memref<1x18x512xf32, #tpu.memory_space<vmem>>, vector<1x16x512xf32>
    %54 = vector.shape_cast %53 : vector<1x16x512xf32> to vector<16x512xf32>
    %55 = arith.truncf %54 : vector<16x512xf32> to vector<16x512xbf16>
    %c1_61 = arith.constant 1 : index
    %c2_62 = arith.constant 2 : index
    %c0_63 = arith.constant 0 : index
    %c0_64 = arith.constant 0 : index
    %56 = vector.load %arg2[%c1_61, %c2_62, %c0_63, %c0_64] : memref<2x3x512x256xbf16, #tpu.memory_space<vmem>>, vector<1x1x512x256xbf16>
    %57 = vector.shape_cast %56 : vector<1x1x512x256xbf16> to vector<512x256xbf16>
    %cst_65 = arith.constant dense<0.000000e+00> : vector<16x256xf32>
    %58 = tpu.matmul %55, %57, %cst_65 {dimension_numbers = #tpu.dot_dimension_numbers<[1], [0], [0], [1], [0, 0, 1, 1], [], []>} : vector<16x512xbf16>, vector<512x256xbf16>, vector<16x256xf32> -> vector<16x256xf32>
    %59 = arith.addf %52, %58 : vector<16x256xf32>
    %cst_66 = arith.constant 0.000000e+00 : f32
    %60 = vector.broadcast %cst_66 : f32 to vector<16x256xf32>
    %61 = arith.maximumf %59, %60 : vector<16x256xf32>
    %62 = arith.truncf %61 : vector<16x256xf32> to vector<16x256xbf16>
    %c1_67 = arith.constant 1 : index
    %c0_68 = arith.constant 0 : index
    %c0_69 = arith.constant 0 : index
    %63 = vector.load %arg3[%c1_67, %c0_68, %c0_69] : memref<2x256x512xbf16, #tpu.memory_space<vmem>>, vector<1x256x512xbf16>
    %64 = vector.shape_cast %63 : vector<1x256x512xbf16> to vector<256x512xbf16>
    %cst_70 = arith.constant dense<0.000000e+00> : vector<16x512xf32>
    %65 = tpu.matmul %62, %64, %cst_70 {dimension_numbers = #tpu.dot_dimension_numbers<[1], [0], [0], [1], [0, 0, 1, 1], [], []>} : vector<16x256xbf16>, vector<256x512xbf16>, vector<16x512xf32> -> vector<16x512xf32>
    %66 = arith.addf %35, %65 : vector<16x512xf32>
    %cst_71 = arith.constant 0.000000e+00 : f32
    %67 = vector.broadcast %cst_71 : f32 to vector<16x512xf32>
    %68 = arith.maximumf %66, %67 : vector<16x512xf32>
    %c0_72 = arith.constant 0 : index
    %c0_73 = arith.constant 0 : index
    %69 = vector.load %arg4[%c0_72, %c0_73] : memref<16x512xf32, #tpu.memory_space<vmem>>, vector<16x512xf32>
    tpu.vector_store %arg4[%c0_72, %c0_73], %68 {strides = array<i32>} : memref<16x512xf32, #tpu.memory_space<vmem>>, vector<16x512xf32>,
    return
  }
  func.func @transform_0(%arg0: i32) -> (i32, i32) {
    %c0_i32 = arith.constant 0 : i32
    %c0_i32_0 = arith.constant 0 : i32
    return %arg0, %c0_i32 : i32, i32
  }
  func.func @transform_1(%arg0: i32) -> (i32, i32, i32, i32) {
    %c0_i32 = arith.constant 0 : i32
    %c0_i32_0 = arith.constant 0 : i32
    %c0_i32_1 = arith.constant 0 : i32
    %c0_i32_2 = arith.constant 0 : i32
    %c0_i32_3 = arith.constant 0 : i32
    return %c0_i32, %c0_i32_0, %c0_i32_1, %c0_i32_2 : i32, i32, i32, i32
  }
  func.func @transform_2(%arg0: i32) -> (i32, i32, i32) {
    %c0_i32 = arith.constant 0 : i32
    %c0_i32_0 = arith.constant 0 : i32
    %c0_i32_1 = arith.constant 0 : i32
    %c0_i32_2 = arith.constant 0 : i32
    return %c0_i32, %c0_i32_0, %c0_i32_1 : i32, i32, i32
  }
  func.func @transform_3(%arg0: i32) -> (i32, i32) {
    %c0_i32 = arith.constant 0 : i32
    %c0_i32_0 = arith.constant 0 : i32
    return %arg0, %c0_i32 : i32, i32
  }
}

</mosaic_0001>

<bundles_post_ra>
// kernel: tpu_custom_call.1
= control target key start
LH: loop header
LB: loop body
LE: loop exit
PB: predicated region body
PF: predicated region fallthrough
CT: control target
= control target key end

     0   :  { %8 = vsyncpa [#allocation4], 0  ;;  %s6489_s0 = inlined_call_operand.hbm [shape: f32[32,512], index: 0, kind: input, shape index: {}]   ;;  %s6490_s1 = inlined_call_operand.hbm [shape: bf16[2,3,512,256], index: 1, kind: input, shape index: {}]   ;;  %s6491_s2 = inlined_call_operand.hbm [shape: bf16[2,256,512], index: 2, kind: input, shape index: {}]   ;;  %s6492_s3 = inlined_call_operand.hbm [shape: f32[32,512], index: 3, kind: output, shape index: {}]  }
   0x1   :  { %10 = vsyncpa [#allocation4 + $0x1], 0 }
   0x2   :  { %11 = vsyncpa [#allocation7], 0 }
   0x3   :  { %12 = vsyncpa [#allocation5], 0 }
   0x4   :  { %14 = vsyncpa [#allocation5 + $0x1], 0  ;;  %s6129_s12 = smov 0   ;;  %s6131_s13 = smov 0  }
   0x5   :  { %s6133_s14 = smov 0   ;;  %s6135_s15 = smov 0  }
   0x6 LB: > { %s6150_s16 = sadd.s32 4294967295, %s6094_s15   ;;  %s4510_s17 = sadd.s32 4294967294, %s6094_s15   ;;  %s6094_s15 = sphi %s6135_s15, %s6512_s15   ;;  %s6090_s14 = sphi %s6133_s14, %s6511_s14   ;;  %s6086_s13 = sphi %s6131_s13, %s6510_s13   ;;  %s6082_s12 = sphi %s6129_s12, %s6509_s12  }
   0x7   : > { %p40_p0 = scmp.ne.s32.totalorder %s6086_s13, %s6082_s12  ;;  %p6493_p1 = scmp.eq.s32.totalorder %s6150_s16, 0 }
   0x8   : > { %p112_p3 = scmp.eq.s32.totalorder %s4510_s17, 1  ;;  %p4511_p5 = scmp.ge.s32.totalorder %s6094_s15, 1 }
   0x9   : > { %p6159_p4 = por %p6493_p1, %p40_p0  ;;  %p119_p7 = scmp.lt.s32.totalorder %s6094_s15, 3 }
   0xa   : > { %p6164_p6 = por %p112_p3, %p40_p0  ;;  %s6096_s21 = smov [#allocation6]  }
   0xb   : > { %s6496_s18 = scalar_select %p6159_p4, 1, 0 }
   0xc   : > { %s6497_s19 = scalar_select %p6164_p6, 1, 0 }
   0xd   : > { %p6169_p8 = pnand %p4511_p5, %p119_p7  ;;  %s131_s22 = sshll.u32 %s6096_s21, 4  ;;  %s6173_s22 = int_to_ptr.vmem [resolvable:$true] %s131_s22 }
   0xe   : > { %s6097_s24 = smov [#allocation8]   ;;  %s5938_s28 = scalar_lea.hbm %s6490_s1, 49152 }
   0xf   : > { %p5098_p9 = pneg %p6169_p8  ;;  %s144_s25 = sshll.u32 %s6097_s24, 4  ;;  %s6184_s25 = int_to_ptr.vmem [resolvable:$true] %s144_s25 }
  0x10   : > { %p5939_p12 = scmp.ne.s32.totalorder %s6490_s1, %s5938_s28  ;;  %p5945_p5 = scmp.lt.u32.totalorder %s5938_s28, %s6490_s1 }
  0x11   : > { %p6180_p11 = pnand %p5098_p9, %p6493_p1 }
  0x13   : > { %p5940_p13 = pneg %p6180_p11 }
  0x15   : > { %p5941_p0 = pnand %p5940_p13, %p5939_p12 }
  0x17   : > { %p5942_p3 = pneg %p5941_p0 }
  0x19   : > { %p5947_p7 = pnand %p5945_p5, %p5942_p3 }
  0x1b   : > { %5950 = shalt.err (!%p5947_p7)
}
  0x1c   : > { %s5951_s6 = scalar_lea.vmem %s6173_s22, 49152  ;;  %p5959_p2 = scmp.lt.s32.totalorder %s6173_s22, %s6173_s22 }
  0x1d   : > { %p5952_p9 = scmp.ne.s32.totalorder %s6173_s22, %s5951_s6  ;;  %p5960_p12 = scmp.lt.s32.totalorder %s5951_s6, %s5951_s6 }
  0x1f   : > { %p5954_p10 = pnand %p5952_p9, %p5940_p13  ;;  %p5961_p0 = por %p5960_p12, %p5959_p2 }
  0x21   : > { %p5955_p1 = pneg %p5954_p10 }
  0x23   : > { %p5962_p6 = pnand %p5961_p0, %p5955_p1 }
  0x25   : > { %5965 = shalt.err (!%p5962_p6)
}
  0x26   : > { %s6098_s7 = smov 128   ;;  %s6099_s8 = smov 8  }
  0x27   : > { %5101 = dma.hbm_to_vmem [thread:$0]  (!%p6180_p11), %s6490_s1, 49152, %s6173_s22, [#allocation7], %s6098_s7, %s6098_s7, %s6099_s8  }
  0x28   : > { %s5966_s21 = scalar_lea.hbm %s6491_s2, 16384 }
  0x29   : > { %p5967_p2 = scmp.ne.s32.totalorder %s6491_s2, %s5966_s21  ;;  %p5973_p10 = scmp.lt.u32.totalorder %s5966_s21, %s6491_s2 }
  0x2b   : > { %p5969_p1 = pnand %p5967_p2, %p5940_p13 }
  0x2d   : > { %p5970_p6 = pneg %p5969_p1 }
  0x2f   : > { %p5975_p3 = pnand %p5973_p10, %p5970_p6 }
  0x31   : > { %5978 = shalt.err (!%p5975_p3)
}
  0x32   : > { %s5979_s22 = scalar_lea.vmem %s6184_s25, 16384  ;;  %p5987_p12 = scmp.lt.s32.totalorder %s6184_s25, %s6184_s25 }
  0x33   : > { %p5980_p5 = scmp.ne.s32.totalorder %s6184_s25, %s5979_s22  ;;  %p5988_p0 = scmp.lt.s32.totalorder %s5979_s22, %s5979_s22 }
  0x35   : > { %p5982_p7 = pnand %p5980_p5, %p5940_p13  ;;  %p5989_p2 = por %p5988_p0, %p5987_p12 }
  0x37   : > { %p5983_p9 = pneg %p5982_p7 }
  0x39   : > { %p5990_p1 = pnand %p5989_p2, %p5983_p9 }
  0x3b   : > { %5993 = shalt.err (!%p5990_p1)
}
  0x3c   : > { %s6100_s29 = smov 256   ;;  %s6101_s30 = smov 16  }
  0x3d   : > { %5104 = dma.hbm_to_vmem [thread:$0]  (!%p6180_p11), %s6491_s2, 16384, %s6184_s25, [#allocation7], %s6100_s29, %s6100_s29, %s6101_s30  }
  0x3e   : > { %s6239_s6 = sadd.s32 1, %s6094_s15   ;;  %s27_s8 = sadd.s32 1, %s6090_s14 }
  0x3f   : > { %s24_s7 = ssub.s32 %s6094_s15, %s6239_s6  ;;  %p34_p6 = scmp.ne.s32.totalorder %s6090_s14, %s6086_s13 }
  0x40   : > { %p25_p13 = scmp.eq.s32.totalorder %s24_s7, 0  ;;  %p35_p10 = scmp.eq.s32.totalorder %s6094_s15, 0 }
  0x41   : > { %p6500_p5 = scmp.eq.s32.totalorder %s6150_s16, 1  ;;  %p5115_p9 = scmp.lt.s32.totalorder %s6094_s15, 2 }
  0x42   : > { %s6248_s9 = scalar_select %p25_p13, %s6090_s14, %s27_s8  }
  0x43   : > { %p36_p3 = por %p35_p10, %p34_p6  ;;  %p6252_p7 = por %p6500_p5, %p34_p6 }
  0x44   : > { %s158_s23 = sand.u32 1, %s6090_s14   ;;  %s5043_s25 = sshll.u32 %s6094_s15, 10 }
  0x45   : > { %s6501_s10 = scalar_select %p6252_p7, 1, 0 }
  0x46   : > { %s4515_s11 = sshll.u32 %s158_s23, 6  ;;  %s6262_s24 = scalar_lea.hbm %s6489_s0, %s5043_s25 }
  0x47   : > { %s162_s26 = scalar_lea.vmem [#allocation3], %s4515_s11  ;;  %p6266_p11 = pnand %p5115_p9, %p36_p3 }
  0x48   : > { %s170_s27 = sshll.u32 %s162_s26, 4  ;;  %s6270_s22 = scalar_lea.sflag [#allocation4], %s158_s23  ;;  %s6264_s27 = int_to_ptr.vmem [resolvable:$true] %s170_s27 }
  0x49   : > { %s5994_s29 = scalar_lea.hbm %s6262_s24, 1024  ;;  %p5996_p0 = pneg %p6266_p11 }
  0x4a   : > { %p5995_p12 = scmp.ne.s32.totalorder %s6262_s24, %s5994_s29  ;;  %s5999_s5 = scalar_lea.hbm %s6489_s0, 2048 }
  0x4b   : > { %p6000_p13 = scmp.lt.u32.totalorder %s6262_s24, %s6489_s0  ;;  %p6001_p6 = scmp.lt.u32.totalorder %s5999_s5, %s5994_s29 }
  0x4c   : > { %p5997_p2 = pnand %p5996_p0, %p5995_p12  ;;  %p6003_p3 = scmp.lt.u32.totalorder %s5994_s29, %s6262_s24 }
  0x4d   : > { %p6002_p10 = por %p6001_p6, %p6000_p13 }
  0x4e   : > { %p5998_p1 = pneg %p5997_p2 }
  0x4f   : > { %p6004_p5 = por %p6003_p3, %p6002_p10 }
  0x51   : > { %p6005_p9 = pnand %p6004_p5, %p5998_p1 }
  0x53   : > { %6008 = shalt.err (!%p6005_p9)
}
  0x54   : > { %s6009_s23 = scalar_lea.vmem %s6264_s27, 1024  ;;  %s6102_s11 = smov [#allocation3]  }
  0x55   : > { %p6010_p12 = scmp.ne.s32.totalorder %s6264_s27, %s6009_s23  ;;  %s6014_s25 = sshll.u32 %s6102_s11, 4  ;;  %s6015_s25 = int_to_ptr.vmem [resolvable:$false] %s6014_s25 }
  0x56   : > { %s6016_s17 = scalar_lea.vmem %s6015_s25, 2048  ;;  %p6017_p4 = scmp.lt.s32.totalorder %s6264_s27, %s6015_s25 }
  0x57   : > { %p6012_p2 = pnand %p6010_p12, %p5996_p0  ;;  %p6018_p13 = scmp.lt.s32.totalorder %s6016_s17, %s6009_s23 }
  0x59   : > { %p6013_p7 = pneg %p6012_p2  ;;  %p6019_p6 = por %p6018_p13, %p6017_p4 }
  0x5b   : > { %p6020_p10 = pnand %p6019_p6, %p6013_p7 }
  0x5d   : > { %6023 = shalt.err (!%p6020_p10)
}
  0x5e   : > { %s6103_s21 = smov 512   ;;  %s6104_s26 = smov 32  }
  0x5f   : > { %5108 = dma.hbm_to_vmem [thread:$0]  (!%p6266_p11), %s6262_s24, 1024, %s6264_s27, %s6270_s22, %s6103_s21, %s6103_s21, %s6104_s26  }
  0x60   : > { %182 = sbr.rel (%p6169_p8) target bundleno = 1787 (0x6fb), region = 32  ;;  %s6301_s29 = sand.u32 (!%p6169_p8), 1, %s6086_s13  }
  0x61   : > { %s4520_s30 = sshll.u32 (!%p6169_p8), %s6301_s29, 6  ;;  %s185_s4 = scalar_lea.sflag (!%p6169_p8), [#allocation4], %s6301_s29 }
  0x62   : > { %s6307_s5 = scalar_lea.vmem (!%p6169_p8), [#allocation3], %s4520_s30  ;;  %p6503_p4 = scmp.ne.s32.totalorder (!%p6169_p8), %s6496_s18, 0 }
  0x67   : > { %6069 = dma.done.wait (%p6503_p4), %s185_s4, 1024  }
  0x68   : > { %6071 = vsyncadd (%p6503_p4), %s185_s4, 4294966272  ;;  %p6504_p7 = scmp.eq.s32.totalorder %s6150_s16, 0 }
  0x6a   : > { %6073 = dma.done.wait (%p6504_p7), [#allocation7], 65536   ;;  %p6505_p8 = pmov %p6504_p7 }
  0x6b   : > { %v5162_v0 = vld [vmem:[#allocation6 + $0x204] ss:$8 sps:$4 sm:$0xff]   ;;  %v5164_v1 = vld [vmem:[#allocation6 + $0x200] ss:$8 sps:$4 sm:$0xff]   ;;  %v5165_v2 = vld [vmem:[#allocation6 + $0x214] ss:$8 sps:$4 sm:$0xff]  }
  0x6c   : > { %6075 = vsyncadd (%p6505_p8), [#allocation7], 4294901760  ;;  %821 = vmatprep.subr.bf16.mxu0 %v5162_v0  ;;  %v5167_v3 = vld [vmem:[#allocation6 + $0x210] ss:$8 sps:$4 sm:$0xff]   ;;  %v5168_v4 = vld [vmem:[#allocation6 + $0x224] ss:$8 sps:$4 sm:$0xff]  }
  0x6d   : > { %822 = vmatpush1.bf16.msra.mxu0 %v5164_v1  ;;  %v5170_v5 = vld [vmem:[#allocation6 + $0x220] ss:$8 sps:$4 sm:$0xff]   ;;  %v5171_v6 = vld [vmem:[#allocation6 + $0x234] ss:$8 sps:$4 sm:$0xff]   ;;  %v5173_v7 = vld [vmem:[#allocation6 + $0x230] ss:$8 sps:$4 sm:$0xff]  }
  0x6e   : > { %823 = vmatprep.subr.bf16.mxu0 %v5165_v2  ;;  %v5174_v8 = vld [vmem:[#allocation6 + $0x244] ss:$8 sps:$4 sm:$0xff]   ;;  %v5176_v9 = vld [vmem:[#allocation6 + $0x240] ss:$8 sps:$4 sm:$0xff]   ;;  %v5177_v10 = vld [vmem:[#allocation6 + $0x254] ss:$8 sps:$4 sm:$0xff]  }
  0x6f   : > { %v5179_v11 = vld [vmem:[#allocation6 + $0x250] ss:$8 sps:$4 sm:$0xff]   ;;  %v5180_v12 = vld [vmem:[#allocation6 + $0x264] ss:$8 sps:$4 sm:$0xff]   ;;  %v5182_v15 = vld [vmem:[#allocation6 + $0x260] ss:$8 sps:$4 sm:$0xff]  }
  0x70   : > { %v231_v13 = vld [vmem:[%s6307_s5 + $0x8] sm:$0xff]  ;;  %v5183_v18 = vld [vmem:[#allocation6 + $0x274] ss:$8 sps:$4 sm:$0xff]   ;;  %v230_v19 = vld [vmem:[%s6307_s5] sm:$0xff]  ;;  %vm254_vm0 = vcmask 1040384   ;;  %vm1402_vm3 = vcmask 1046528  }
  0x71   : > { %824 = vmatpush1.bf16.msra.mxu0 %v5167_v3  ;;  %v235_v14 = vld [vmem:[%s6307_s5 + $0x28] sm:$0xff]  ;;  %v239_v16 = vmax.f32 %v231_v13, 0.0  ;;  %v234_v20 = vld [vmem:[%s6307_s5 + $0x20] sm:$0xff]  ;;  %v238_v23 = vmax.f32 %v230_v19, 0.0  ;;  %v5185_v27 = vld [vmem:[#allocation6 + $0x270] ss:$8 sps:$4 sm:$0xff]  }
  0x72   : > { %825 = vmatprep.subr.bf16.mxu0 %v5168_v4  ;;  %v243_v17 = vmax.f32 %v235_v14, 0.0  ;;  %v242_v24 = vmax.f32 %v234_v20, 0.0  ;;  %v5186_v28 = vld [vmem:[#allocation6 + $0x284] ss:$8 sps:$4 sm:$0xff]   ;;  %v5188_v29 = vld [vmem:[#allocation6 + $0x280] ss:$8 sps:$4 sm:$0xff]  }
  0x73   : > { %v256_v21 = vrot.slane %v239_v16, 7  ;;  %v255_v25 = vrot.slane %v238_v23, 7  ;;  %v5189_v31 = vld [vmem:[#allocation6 + $0x294] ss:$8 sps:$4 sm:$0xff]   ;;  %v5191_v36 = vld [vmem:[#allocation6 + $0x290] ss:$8 sps:$4 sm:$0xff]  }
  0x74   : > { %v261_v22 = vrot.slane %v243_v17, 7  ;;  %v259_v26 = vrot.slane %v242_v24, 7  ;;  %v5192_v37 = vld [vmem:[#allocation6 + $0x2a4] ss:$8 sps:$4 sm:$0xff]   ;;  %v5194_v43 = vld [vmem:[#allocation6 + $0x2a0] ss:$8 sps:$4 sm:$0xff]  }
  0x75   : > { %826 = vmatpush1.bf16.msra.mxu0 %v5170_v5  ;;  %280 = vst [vmem:[#allocation2 + $0x8] sm:$0xfe] %v256_v21  ;;  %279 = vst [vmem:[#allocation2] sm:$0xfe] %v255_v25  ;;  %vm448_vm1 = vsmask.f32 7424 }
  0x76   : > { %827 = vmatprep.subr.bf16.mxu0 %v5171_v6  ;;  %288 = vst [vmem:[#allocation2 + $0x48] sm:$0x1] %v261_v22  ;;  %287 = vst [vmem:[#allocation2 + $0x40] sm:$0x1] %v259_v26  ;;  %v6322_v30 = vsel %vm254_vm0, %v256_v21, %v261_v22  ;;  %v5195_v44 = vld [vmem:[#allocation6 + $0x2b4] ss:$8 sps:$4 sm:$0xff]   ;;  %v6327_v49 = vsel %vm254_vm0, %v255_v25, %v259_v26 }
  0x77   : > { %v5197_v47 = vld [vmem:[#allocation6 + $0x2b0] ss:$8 sps:$4 sm:$0xff]   ;;  %v5198_v48 = vld [vmem:[#allocation6 + $0x2c4] ss:$8 sps:$4 sm:$0xff]   ;;  %v5200_v51 = vld [vmem:[#allocation6 + $0x2c0] ss:$8 sps:$4 sm:$0xff]  }
  0x78   : > { %v233_v52 = vld [vmem:[%s6307_s5 + $0x18] sm:$0xff]  ;;  %v232_v59 = vld [vmem:[%s6307_s5 + $0x10] sm:$0xff]  ;;  %v5204_v6 = vld [vmem:[#allocation6 + $0x2e4] ss:$8 sps:$4 sm:$0xff]   ;;  %s218_s18 = scalar_lea.vmem [#allocation9], %s4520_s30  ;;  %s5045_s24 = sshll.u32 %s6150_s16, 10 }
  0x79   : > { %828 = vmatpush1.bf16.msra.mxu0 %v5173_v7  ;;  %v237_v53 = vld [vmem:[%s6307_s5 + $0x38] sm:$0xff]  ;;  %v241_v56 = vmax.f32 %v233_v52, 0.0  ;;  %v236_v60 = vld [vmem:[%s6307_s5 + $0x30] sm:$0xff]  ;;  %v240_v63 = vmax.f32 %v232_v59, 0.0  ;;  %v5212_v23 = vld [vmem:[#allocation6 + $0x304] ss:$8 sps:$4 sm:$0xff]   ;;  %s6445_s22 = scalar_lea.hbm %s6492_s3, %s5045_s24 }
  0x7a   : > { %829 = vmatprep.subr.bf16.mxu0 %v5174_v8  ;;  %v5201_v54 = vld [vmem:[#allocation6 + $0x2d4] ss:$8 sps:$4 sm:$0xff]   ;;  %v245_v57 = vmax.f32 %v237_v53, 0.0  ;;  %v244_v0 = vmax.f32 %v236_v60, 0.0  ;;  %v5203_v1 = vld [vmem:[#allocation6 + $0x2d0] ss:$8 sps:$4 sm:$0xff]   ;;  %v221_v8 = vlaneseq }
  0x7b   : > { %v258_v61 = vrot.slane %v241_v56, 7  ;;  %v257_v4 = vrot.slane %v240_v63, 7  ;;  %v5207_v13 = vld [vmem:[#allocation6 + $0x2f4] ss:$8 sps:$4 sm:$0xff]   ;;  %v5237_v52 = vld [vmem:[#allocation6 + $0x390] ss:$8 sps:$4 sm:$0xff]  }
  0x7c   : > { %v368_v32 = vld [vmem:[#allocation2 + $0x8] sm:$0xfe]  ;;  %v367_v50 = vld [vmem:[#allocation2] sm:$0xfe]  ;;  %v265_v62 = vrot.slane %v245_v57, 7  ;;  %v263_v5 = vrot.slane %v244_v0, 7 }
  0x7d   : > { %830 = vmatpush1.bf16.msra.mxu0 %v5176_v9  ;;  %v372_v33 = vld [vmem:[#allocation2 + $0x48] sm:$0x1]  ;;  %v376_v34 = vpack.c.bf16 %v6322_v30, %v368_v32  ;;  %v375_v55 = vpack.c.bf16 %v6327_v49, %v367_v50  ;;  %v371_v58 = vld [vmem:[#allocation2 + $0x40] sm:$0x1]  ;;  %282 = vst [vmem:[#allocation2 + $0x18] sm:$0xfe] %v258_v61 }
  0x7e   : > { %831 = vmatprep.subr.bf16.mxu0 %v5177_v10  ;;  %v380_v35 = vpack.c.bf16 %v372_v33, %v372_v33  ;;  %v379_v2 = vpack.c.bf16 %v371_v58, %v371_v58  ;;  %290 = vst [vmem:[#allocation2 + $0x58] sm:$0x1] %v265_v62  ;;  %v6335_v7 = vsel %vm254_vm0, %v257_v4, %v263_v5  ;;  %281 = vst [vmem:[#allocation2 + $0x10] sm:$0xfe] %v257_v4  ;;  %v5206_v9 = vld [vmem:[#allocation6 + $0x2e0] ss:$8 sps:$4 sm:$0xff]  }
  0x7f   : > { %v462_v38 = vshrl.u32 %v376_v34, 16  ;;  %v464_v39 = vshll.u32 %v376_v34, 16  ;;  %v452_v3 = vshll.u32 %v375_v55, 16  ;;  %289 = vst [vmem:[#allocation2 + $0x50] sm:$0x1] %v263_v5  ;;  %v450_v10 = vshrl.u32 %v375_v55, 16 }
  0x80   : > { %v469_v40 = vshll.u32 %v380_v35, 16  ;;  %vm223_vm2 = vcmp.lt.s32.totalorder %v221_v8, 512  ;;  %v6338_v14 = vsel %vm254_vm0, %v258_v61, %v265_v62  ;;  %v5215_v32 = vld [vmem:[#allocation6 + $0x314] ss:$8 sps:$4 sm:$0xff]   ;;  %v5213_v34 = vld [vmem:[#allocation6 + $0x310] ss:$8 sps:$4 sm:$0xff]  }
  0x81   : > { %832 = vmatpush1.bf16.msra.mxu0 %v5179_v11  ;;  %v466_v41 = vrot.slane %v464_v39, 1  ;;  %v454_v11 = vrot.slane %v452_v3, 1  ;;  %v5219_v39 = vld [vmem:[#allocation6 + $0x330] ss:$8 sps:$4 sm:$0xff]   ;;  %v5234_v50 = vld [vmem:[#allocation6 + $0x380] ss:$8 sps:$4 sm:$0xff]  }
  0x82   : > { %833 = vmatprep.subr.bf16.mxu0 %v5180_v12  ;;  %v471_v42 = vrot.slane %v469_v40, 1  ;;  %v457_v12 = vshll.u32 %v379_v2, 16  ;;  %v5224_v40 = vld [vmem:[#allocation6 + $0x344] ss:$8 sps:$4 sm:$0xff]   ;;  %v5245_v55 = vld [vmem:[#allocation6 + $0x3b4] ss:$8 sps:$4 sm:$0xff]  }
  0x83   : > { %v467_v45 = vor.u32 %v466_v41, %v462_v38  ;;  %v455_v19 = vor.u32 %v454_v11, %v450_v10  ;;  %v5221_v38 = vld [vmem:[#allocation6 + $0x334] ss:$8 sps:$4 sm:$0xff]   ;;  %v5222_v41 = vld [vmem:[#allocation6 + $0x340] ss:$8 sps:$4 sm:$0xff]   ;;  %v5242_v53 = vld [vmem:[#allocation6 + $0x3a4] ss:$8 sps:$4 sm:$0xff]  }
  0x84   : > { %v370_v16 = vld [vmem:[#allocation2 + $0x18] sm:$0xfe]  ;;  %v459_v20 = vrot.slane %v457_v12, 1  ;;  %v5248_v57 = vld [vmem:[#allocation6 + $0x3c4] ss:$8 sps:$4 sm:$0xff]   ;;  %s4418_s20 = sshll.u32 %s218_s18, 4  ;;  %s6439_s20 = int_to_ptr.vmem [resolvable:$true] %s4418_s20 }
  0x85   : > { %834 = vmatpush1.bf16.msra.mxu0 %v5182_v15  ;;  %v472_v46 = vsel %vm448_vm1, %v467_v45, %v471_v42  ;;  %v6105_v15 = vmov 0.0   ;;  %v374_v17 = vld [vmem:[#allocation2 + $0x58] sm:$0x1]  ;;  %v378_v21 = vpack.c.bf16 %v6338_v14, %v370_v16  ;;  %v5227_v42 = vld [vmem:[#allocation6 + $0x354] ss:$8 sps:$4 sm:$0xff]   ;;  %s4404_s16 = scalar_lea.sflag [#allocation5], %s6301_s29 }
  0x86   : > { %835 = vmatprep.subr.bf16.mxu0 %v5183_v18  ;;  %853 = vmatprep.mubr.bf16.mxu0 %v472_v46  ;;  %225 = vst.msk [vmem:[#allocation2] ss:$8 sm:$0xf] %vm223_vm2, %v6105_v15  ;;  %228 = vst.msk [vmem:[#allocation2 + $0x41] ss:$8 sm:$0xf] %vm223_vm2, %v6105_v15  ;;  %v382_v22 = vpack.c.bf16 %v374_v17, %v374_v17 }
  0x87   : > { %v5209_v18 = vld [vmem:[#allocation6 + $0x2f0] ss:$8 sps:$4 sm:$0xff]   ;;  %v486_v24 = vshrl.u32 %v378_v21, 16  ;;  %v488_v25 = vshll.u32 %v378_v21, 16  ;;  %v5228_v45 = vld [vmem:[#allocation6 + $0x360] ss:$8 sps:$4 sm:$0xff]  }
  0x88   : > { %v493_v26 = vshll.u32 %v382_v22, 16  ;;  %v5233_v46 = vld [vmem:[#allocation6 + $0x374] ss:$8 sps:$4 sm:$0xff]   ;;  %v5243_v56 = vld [vmem:[#allocation6 + $0x3b0] ss:$8 sps:$4 sm:$0xff]   ;;  %s6024_s7 = scalar_lea.vmem %s6439_s20, 1024 }
  0x89   : > { %836 = vmatpush1.bf16.msra.mxu0 %v5185_v27  ;;  %v5210_v27 = vld [vmem:[#allocation6 + $0x300] ss:$8 sps:$4 sm:$0xff]   ;;  %v369_v58 = vld [vmem:[#allocation2 + $0x10] sm:$0xfe]  ;;  %v373_v61 = vld [vmem:[#allocation2 + $0x50] sm:$0x1]  ;;  %p6025_p11 = scmp.ne.s32.totalorder %s6439_s20, %s6024_s7 }
  0x8a   : > { %837 = vmatprep.subr.bf16.mxu0 %v5186_v28  ;;  %v460_v28 = vsel %vm448_vm1, %v455_v19, %v459_v20  ;;  %v5246_v59 = vld [vmem:[#allocation6 + $0x3c0] ss:$8 sps:$4 sm:$0xff]   ;;  %v5251_v60 = vld [vmem:[#allocation6 + $0x3d4] ss:$8 sps:$4 sm:$0xff]   ;;  %v377_v62 = vpack.c.bf16 %v6335_v7, %v369_v58  ;;  %v5249_v63 = vld [vmem:[#allocation6 + $0x3d0] ss:$8 sps:$4 sm:$0xff]  }
  0x8b   : > { %v5254_v0 = vld [vmem:[#allocation6 + $0x3e4] ss:$8 sps:$4 sm:$0xff]   ;;  %v5252_v3 = vld [vmem:[#allocation6 + $0x3e0] ss:$8 sps:$4 sm:$0xff]   ;;  %v5257_v4 = vld [vmem:[#allocation6 + $0x3f4] ss:$8 sps:$4 sm:$0xff]  }
  0x8c   : > { %v476_v2 = vshll.u32 %v377_v62, 16  ;;  %v474_v5 = vshrl.u32 %v377_v62, 16  ;;  %v5260_v10 = vld [vmem:[#allocation6 + $0x4] ss:$8 sps:$4 sm:$0xff]   ;;  %v5258_v15 = vld [vmem:[#allocation6] ss:$8 sps:$4 sm:$0xff]  }
  0x8d   : > { %838 = vmatpush1.bf16.msra.mxu0 %v5188_v29  ;;  %v490_v29 = vrot.slane %v488_v25, 1  ;;  %v5261_v19 = vld [vmem:[#allocation6 + $0x10] ss:$8 sps:$4 sm:$0xff]   ;;  %v5266_v20 = vld [vmem:[#allocation6 + $0x24] ss:$8 sps:$4 sm:$0xff]   ;;  %p6506_p0 = scmp.ne.s32.totalorder %s6501_s10, 0 }
  0x8e   : > { %839 = vmatprep.subr.bf16.mxu0 %v5189_v31  ;;  %v495_v31 = vrot.slane %v493_v26, 1  ;;  %v5264_v21 = vld [vmem:[#allocation6 + $0x20] ss:$8 sps:$4 sm:$0xff]   ;;  %v5269_v22 = vld [vmem:[#allocation6 + $0x34] ss:$8 sps:$4 sm:$0xff]   ;;  %s6106_s8 = smov [#allocation9]  }
  0x8f   : > { %v491_v33 = vor.u32 %v490_v29, %v486_v24  ;;  %v5272_v24 = vld [vmem:[#allocation6 + $0x44] ss:$8 sps:$4 sm:$0xff]   ;;  %v5270_v25 = vld [vmem:[#allocation6 + $0x40] ss:$8 sps:$4 sm:$0xff]   ;;  %v5275_v26 = vld [vmem:[#allocation6 + $0x54] ss:$8 sps:$4 sm:$0xff]   ;;  %p6026_p1 = pnand %p6025_p11, %p6506_p0 }
  0x90   : > { %v5276_v29 = vld [vmem:[#allocation6 + $0x60] ss:$8 sps:$4 sm:$0xff]   ;;  %v5314_v58 = vld [vmem:[#allocation6 + $0x124] ss:$8 sps:$4 sm:$0xff]   ;;  %s6028_s23 = sshll.u32 %s6106_s8, 4  ;;  %s6029_s23 = int_to_ptr.vmem [resolvable:$false] %s6028_s23 }
  0x91   : > { %840 = vmatpush1.bf16.msra.mxu0 %v5191_v36  ;;  %v496_v35 = vsel %vm448_vm1, %v491_v33, %v495_v31  ;;  %v5218_v36 = vld [vmem:[#allocation6 + $0x324] ss:$8 sps:$4 sm:$0xff]   ;;  %v5281_v31 = vld [vmem:[#allocation6 + $0x74] ss:$8 sps:$4 sm:$0xff]   ;;  %p6027_p3 = pneg %p6026_p1  ;;  %s6030_s11 = scalar_lea.vmem %s6029_s23, 2048 }
  0x92   : > { %841 = vmatprep.subr.bf16.mxu0 %v5192_v37  ;;  %v5216_v37 = vld [vmem:[#allocation6 + $0x320] ss:$8 sps:$4 sm:$0xff]   ;;  %v5284_v33 = vld [vmem:[#allocation6 + $0x84] ss:$8 sps:$4 sm:$0xff]   ;;  %p6031_p5 = scmp.lt.s32.totalorder %s6439_s20, %s6029_s23  ;;  %p6032_p9 = scmp.lt.s32.totalorder %s6030_s11, %s6024_s7 }
  0x93   : > { %v5320_v62 = vld [vmem:[#allocation6 + $0x144] ss:$8 sps:$4 sm:$0xff]  }
  0x94   : > { %p6033_p12 = por %p6032_p9, %p6031_p5 }
  0x95   : > { %842 = vmatpush1.bf16.msra.mxu0 %v5194_v43  ;;  %v5225_v43 = vld [vmem:[#allocation6 + $0x350] ss:$8 sps:$4 sm:$0xff]  }
  0x96   : > { %843 = vmatprep.subr.bf16.mxu0 %v5195_v44  ;;  %v5230_v44 = vld [vmem:[#allocation6 + $0x364] ss:$8 sps:$4 sm:$0xff]   ;;  %p6034_p2 = pnand %p6033_p12, %p6027_p3 }
  0x99   : > { %844 = vmatpush1.bf16.msra.mxu0 %v5197_v47  ;;  %v5231_v47 = vld [vmem:[#allocation6 + $0x370] ss:$8 sps:$4 sm:$0xff]  }
  0x9a   : > { %845 = vmatprep.subr.bf16.mxu0 %v5198_v48  ;;  %v5236_v48 = vld [vmem:[#allocation6 + $0x384] ss:$8 sps:$4 sm:$0xff]  }
  0x9d   : > { %846 = vmatpush1.bf16.msra.mxu0 %v5200_v51  ;;  %v5239_v51 = vld [vmem:[#allocation6 + $0x394] ss:$8 sps:$4 sm:$0xff]  }
  0x9e   : > { %847 = vmatprep.subr.bf16.mxu0 %v5201_v54  ;;  %v5240_v54 = vld [vmem:[#allocation6 + $0x3a0] ss:$8 sps:$4 sm:$0xff]  }
  0xa1   : > { %848 = vmatpush1.bf16.msra.mxu0 %v5203_v1  ;;  %v381_v1 = vpack.c.bf16 %v373_v61, %v373_v61  ;;  %v5315_v61 = vld [vmem:[#allocation6 + $0x130] ss:$8 sps:$4 sm:$0xff]  }
  0xa2   : > { %849 = vmatprep.subr.bf16.mxu0 %v5204_v6  ;;  %v478_v6 = vrot.slane %v476_v2, 1  ;;  %v5326_v2 = vld [vmem:[#allocation6 + $0x164] ss:$8 sps:$4 sm:$0xff]  }
  0xa3   : > { %v481_v8 = vshll.u32 %v381_v1, 16  ;;  %v5321_v1 = vld [vmem:[#allocation6 + $0x150] ss:$8 sps:$4 sm:$0xff]  }
  0xa4   : > { %v479_v11 = vor.u32 %v478_v6, %v474_v5  ;;  %v5327_v5 = vld [vmem:[#allocation6 + $0x170] ss:$8 sps:$4 sm:$0xff]   ;;  %v5332_v6 = vld [vmem:[#allocation6 + $0x184] ss:$8 sps:$4 sm:$0xff]  }
  0xa5   : > { %850 = vmatpush1.bf16.msra.mxu0 %v5206_v9  ;;  %v5255_v9 = vld [vmem:[#allocation6 + $0x3f0] ss:$8 sps:$4 sm:$0xff]   ;;  %v483_v12 = vrot.slane %v481_v8, 1  ;;  %v5330_v8 = vld [vmem:[#allocation6 + $0x180] ss:$8 sps:$4 sm:$0xff]  }
  0xa6   : > { %851 = vmatprep.subr.bf16.mxu0 %v5207_v13  ;;  %v292_v13 = vld [vmem:[#allocation2 + $0x8] sm:$0xff] }
  0xa7   : > { %v484_v16 = vsel %vm448_vm1, %v479_v11, %v483_v12  ;;  %v300_v17 = vpack.c.bf16 %v6322_v30, %v292_v13  ;;  %v5338_v11 = vld [vmem:[#allocation6 + $0x1a4] ss:$8 sps:$4 sm:$0xff]   ;;  %v5336_v12 = vld [vmem:[#allocation6 + $0x1a0] ss:$8 sps:$4 sm:$0xff]   ;;  %v5341_v13 = vld [vmem:[#allocation6 + $0x1b4] ss:$8 sps:$4 sm:$0xff]  }
  0xa9   : > { %852 = vmatpush1.bf16.msra.mxu0 %v5209_v18  ;;  %v5263_v18 = vld [vmem:[#allocation6 + $0x14] ss:$8 sps:$4 sm:$0xff]  }
  0xaa   : > { %864 = vmatprep.subr.bf16.mxu0 %v5212_v23  ;;  %v5267_v23 = vld [vmem:[#allocation6 + $0x30] ss:$8 sps:$4 sm:$0xff]  }
  0xac   : > { %854 = vmatmul.mubr.bf16.vlgmr.msra.gmra.mrb[0].mxu0 %v460_v28  ;;  %v5278_v28 = vld [vmem:[#allocation6 + $0x64] ss:$8 sps:$4 sm:$0xff]  }
  0xad   : > { %865 = vmatpush1.bf16.msra.mxu0 %v5210_v27  ;;  %896 = vmatprep.mubr.bf16.mxu0 %v496_v35  ;;  %v5273_v27 = vld [vmem:[#allocation6 + $0x50] ss:$8 sps:$4 sm:$0xff]   ;;  %v5287_v35 = vld [vmem:[#allocation6 + $0x94] ss:$8 sps:$4 sm:$0xff]  }
  0xae   : > { %866 = vmatprep.subr.bf16.mxu0 %v5215_v32  ;;  %v5279_v32 = vld [vmem:[#allocation6 + $0x70] ss:$8 sps:$4 sm:$0xff]  }
  0xb1   : > { %867 = vmatpush1.bf16.msra.mxu0 %v5213_v34  ;;  %v5282_v34 = vld [vmem:[#allocation6 + $0x80] ss:$8 sps:$4 sm:$0xff]  }
  0xb2   : > { %868 = vmatprep.subr.bf16.mxu0 %v5218_v36  ;;  %v5285_v36 = vld [vmem:[#allocation6 + $0x90] ss:$8 sps:$4 sm:$0xff]  }
  0xb5   : > { %869 = vmatpush1.bf16.msra.mxu0 %v5216_v37  ;;  %v5290_v37 = vld [vmem:[#allocation6 + $0xa4] ss:$8 sps:$4 sm:$0xff]  }
  0xb6   : > { %870 = vmatprep.subr.bf16.mxu0 %v5221_v38  ;;  %v5288_v38 = vld [vmem:[#allocation6 + $0xa0] ss:$8 sps:$4 sm:$0xff]  }
  0xb9   : > { %871 = vmatpush1.bf16.msra.mxu0 %v5219_v39  ;;  %v5293_v39 = vld [vmem:[#allocation6 + $0xb4] ss:$8 sps:$4 sm:$0xff]  }
  0xba   : > { %872 = vmatprep.subr.bf16.mxu0 %v5224_v40  ;;  %v5291_v40 = vld [vmem:[#allocation6 + $0xb0] ss:$8 sps:$4 sm:$0xff]  }
  0xbd   : > { %873 = vmatpush1.bf16.msra.mxu0 %v5222_v41  ;;  %v5296_v41 = vld [vmem:[#allocation6 + $0xc4] ss:$8 sps:$4 sm:$0xff]  }
  0xbe   : > { %874 = vmatprep.subr.bf16.mxu0 %v5227_v42  ;;  %v5294_v42 = vld [vmem:[#allocation6 + $0xc0] ss:$8 sps:$4 sm:$0xff]  }
  0xc1   : > { %875 = vmatpush1.bf16.msra.mxu0 %v5225_v43  ;;  %v5299_v43 = vld [vmem:[#allocation6 + $0xd4] ss:$8 sps:$4 sm:$0xff]  }
  0xc2   : > { %876 = vmatprep.subr.bf16.mxu0 %v5230_v44  ;;  %v5297_v44 = vld [vmem:[#allocation6 + $0xd0] ss:$8 sps:$4 sm:$0xff]  }
  0xc5   : > { %877 = vmatpush1.bf16.msra.mxu0 %v5228_v45  ;;  %v5302_v45 = vld [vmem:[#allocation6 + $0xe4] ss:$8 sps:$4 sm:$0xff]  }
  0xc6   : > { %878 = vmatprep.subr.bf16.mxu0 %v5233_v46  ;;  %v5300_v46 = vld [vmem:[#allocation6 + $0xe0] ss:$8 sps:$4 sm:$0xff]  }
  0xc9   : > { %879 = vmatpush1.bf16.msra.mxu0 %v5231_v47  ;;  %v5305_v47 = vld [vmem:[#allocation6 + $0xf4] ss:$8 sps:$4 sm:$0xff]  }
  0xca   : > { %880 = vmatprep.subr.bf16.mxu0 %v5236_v48  ;;  %v5303_v48 = vld [vmem:[#allocation6 + $0xf0] ss:$8 sps:$4 sm:$0xff]  }
  0xcd   : > { %881 = vmatpush1.bf16.msra.mxu0 %v5234_v50  ;;  %v291_v50 = vld [vmem:[#allocation2] sm:$0xff] }
  0xce   : > { %882 = vmatprep.subr.bf16.mxu0 %v5239_v51  ;;  %v5308_v51 = vld [vmem:[#allocation6 + $0x104] ss:$8 sps:$4 sm:$0xff]  }
  0xd1   : > { %883 = vmatpush1.bf16.msra.mxu0 %v5237_v52  ;;  %v294_v52 = vld [vmem:[#allocation2 + $0x18] sm:$0xff] }
  0xd2   : > { %884 = vmatprep.subr.bf16.mxu0 %v5242_v53  ;;  %v299_v53 = vpack.c.bf16 %v6327_v49, %v291_v50  ;;  %v5461_v50 = vld [vmem:[#allocation8 + $0x60] ss:$16 sps:$4 sm:$0xff]  }
  0xd5   : > { %885 = vmatpush1.bf16.msra.mxu0 %v5240_v54  ;;  %v5306_v54 = vld [vmem:[#allocation6 + $0x100] ss:$8 sps:$4 sm:$0xff]  }
  0xd6   : > { %886 = vmatprep.subr.bf16.mxu0 %v5245_v55  ;;  %v302_v55 = vpack.c.bf16 %v6338_v14, %v294_v52  ;;  %v5366_v52 = vld [vmem:[#allocation6 + $0x440] ss:$8 sps:$4 sm:$0xff]  }
  0xd9   : > { %887 = vmatpush1.bf16.msra.mxu0 %v5243_v56  ;;  %v5311_v56 = vld [vmem:[#allocation6 + $0x114] ss:$8 sps:$4 sm:$0xff]  }
  0xda   : > { %888 = vmatprep.subr.bf16.mxu0 %v5248_v57  ;;  %v5309_v57 = vld [vmem:[#allocation6 + $0x110] ss:$8 sps:$4 sm:$0xff]  }
  0xdd   : > { %889 = vmatpush1.bf16.msra.mxu0 %v5246_v59  ;;  %v5312_v59 = vld [vmem:[#allocation6 + $0x120] ss:$8 sps:$4 sm:$0xff]  }
  0xde   : > { %890 = vmatprep.subr.bf16.mxu0 %v5251_v60  ;;  %v5317_v60 = vld [vmem:[#allocation6 + $0x134] ss:$8 sps:$4 sm:$0xff]  }
  0xe1   : > { %891 = vmatpush1.bf16.msra.mxu0 %v5249_v63  ;;  %v5318_v63 = vld [vmem:[#allocation6 + $0x140] ss:$8 sps:$4 sm:$0xff]  }
  0xe2   : > { %892 = vmatprep.subr.bf16.mxu0 %v5254_v0  ;;  %v5323_v0 = vld [vmem:[#allocation6 + $0x154] ss:$8 sps:$4 sm:$0xff]  }
  0xe5   : > { %893 = vmatpush1.bf16.msra.mxu0 %v5252_v3  ;;  %v5324_v3 = vld [vmem:[#allocation6 + $0x160] ss:$8 sps:$4 sm:$0xff]  }
  0xe6   : > { %894 = vmatprep.subr.bf16.mxu0 %v5257_v4  ;;  %v5329_v4 = vld [vmem:[#allocation6 + $0x174] ss:$8 sps:$4 sm:$0xff]  }
  0xe9   : > { %895 = vmatpush1.bf16.msra.mxu0 %v5255_v9  ;;  %v5335_v9 = vld [vmem:[#allocation6 + $0x194] ss:$8 sps:$4 sm:$0xff]  }
  0xea   : > { %1227 = vmatprep.subr.bf16.mxu0 %v5260_v10  ;;  %v5333_v10 = vld [vmem:[#allocation6 + $0x190] ss:$8 sps:$4 sm:$0xff]  }
  0xec   : > { %897 = vmatmul.mubr.bf16.vlgmr.msra.gmra.mrb[0].mxu0 %v484_v16  ;;  %v5344_v16 = vld [vmem:[#allocation6 + $0x1c4] ss:$8 sps:$4 sm:$0xff]  }
  0xed   : > { %1228 = vmatpush1.bf16.msra.mxu0 %v5258_v15  ;;  %1259 = vmatprep.mubr.bf16.mxu0 %v300_v17  ;;  %v5339_v15 = vld [vmem:[#allocation6 + $0x1b0] ss:$8 sps:$4 sm:$0xff]   ;;  %v5342_v17 = vld [vmem:[#allocation6 + $0x1c0] ss:$8 sps:$4 sm:$0xff]  }
  0xee   : > { %1229 = vmatprep.subr.bf16.mxu0 %v5263_v18  ;;  %v5347_v18 = vld [vmem:[#allocation6 + $0x1d4] ss:$8 sps:$4 sm:$0xff]  }
  0xf1   : > { %1230 = vmatpush1.bf16.msra.mxu0 %v5261_v19  ;;  %v5345_v19 = vld [vmem:[#allocation6 + $0x1d0] ss:$8 sps:$4 sm:$0xff]  }
  0xf2   : > { %1231 = vmatprep.subr.bf16.mxu0 %v5266_v20  ;;  %v5350_v20 = vld [vmem:[#allocation6 + $0x1e4] ss:$8 sps:$4 sm:$0xff]  }
  0xf5   : > { %1232 = vmatpush1.bf16.msra.mxu0 %v5264_v21  ;;  %v1314_v21 = vld [vmem:[#allocation2 + $0x8] sm:$0xfc] }
  0xf6   : > { %1233 = vmatprep.subr.bf16.mxu0 %v5269_v22  ;;  %v1318_v22 = vld [vmem:[#allocation2 + $0x48] sm:$0x3] }
  0xf9   : > { %1234 = vmatpush1.bf16.msra.mxu0 %v5267_v23  ;;  %v5348_v23 = vld [vmem:[#allocation6 + $0x1e0] ss:$8 sps:$4 sm:$0xff]  }
  0xfa   : > { %1235 = vmatprep.subr.bf16.mxu0 %v5272_v24  ;;  %v5353_v24 = vld [vmem:[#allocation6 + $0x1f4] ss:$8 sps:$4 sm:$0xff]  }
  0xfd   : > { %1236 = vmatpush1.bf16.msra.mxu0 %v5270_v25  ;;  %v1322_v25 = vpack.c.bf16 %v6322_v30, %v1314_v21  ;;  %v5452_v30 = vld [vmem:[#allocation8] ss:$16 sps:$4 sm:$0xff]   ;;  %v5486_v21 = vld [vmem:[#allocation8 + $0x184] ss:$16 sps:$4 sm:$0xff]  }
  0xfe   : > { %1237 = vmatprep.subr.bf16.mxu0 %v5275_v26  ;;  %v1326_v26 = vpack.c.bf16 %v1318_v22, %v1318_v22  ;;  %v5390_v22 = vld [vmem:[#allocation6 + $0x4c0] ss:$8 sps:$4 sm:$0xff]  }
 0x101   : > { %1238 = vmatpush1.bf16.msra.mxu0 %v5273_v27  ;;  %v5351_v27 = vld [vmem:[#allocation6 + $0x1f0] ss:$8 sps:$4 sm:$0xff]  }
 0x102   : > { %1239 = vmatprep.subr.bf16.mxu0 %v5278_v28  ;;  %v293_v28 = vld [vmem:[#allocation2 + $0x10] sm:$0xff] }
 0x105   : > { %1240 = vmatpush1.bf16.msra.mxu0 %v5276_v29  ;;  %v5356_v29 = vld [vmem:[#allocation6 + $0x404] ss:$8 sps:$4 sm:$0xff]  }
 0x106   : > { %1241 = vmatprep.subr.bf16.mxu0 %v5281_v31  ;;  %v1406_v31 = vrot.slane %v1322_v25, 1  ;;  %v5489_v25 = vld [vmem:[#allocation8 + $0x1a4] ss:$16 sps:$4 sm:$0xff]  }
 0x109   : > { %1242 = vmatpush1.bf16.msra.mxu0 %v5279_v32  ;;  %v1407_v32 = vrot.slane %v1326_v26, 1  ;;  %v5393_v26 = vld [vmem:[#allocation6 + $0x4d0] ss:$8 sps:$4 sm:$0xff]  }
 0x10a   : > { %1243 = vmatprep.subr.bf16.mxu0 %v5284_v33  ;;  %v301_v33 = vpack.c.bf16 %v6335_v7, %v293_v28  ;;  %v1313_v28 = vld [vmem:[#allocation2] sm:$0xfc] }
 0x10d   : > { %1244 = vmatpush1.bf16.msra.mxu0 %v5282_v34  ;;  %v5354_v34 = vld [vmem:[#allocation6 + $0x400] ss:$8 sps:$4 sm:$0xff]  }
 0x10e   : > { %1245 = vmatprep.subr.bf16.mxu0 %v5287_v35  ;;  %v5359_v35 = vld [vmem:[#allocation6 + $0x414] ss:$8 sps:$4 sm:$0xff]  }
 0x111   : > { %1246 = vmatpush1.bf16.msra.mxu0 %v5285_v36  ;;  %v1408_v36 = vsel %vm1402_vm3, %v1406_v31, %v1407_v32  ;;  %v1316_v31 = vld [vmem:[#allocation2 + $0x18] sm:$0xfc]  ;;  %v1320_v32 = vld [vmem:[#allocation2 + $0x58] sm:$0x3] }
 0x112   : > { %1247 = vmatprep.subr.bf16.mxu0 %v5290_v37  ;;  %v5450_v37 = vld [vmem:[#allocation8 + $0x4] ss:$16 sps:$4 sm:$0xff]  }
 0x113   : > { %2219 = vmatprep.subr.bf16.mxu1 %v5450_v37  ;;  %v5401_v37 = vld [vmem:[#allocation6 + $0x4f4] ss:$8 sps:$4 sm:$0xff]  }
 0x114   : > { %2220 = vmatpush1.bf16.msra.mxu1 %v5452_v30  ;;  %v1324_v30 = vpack.c.bf16 %v6338_v14, %v1316_v31  ;;  %v5405_v14 = vld [vmem:[#allocation6 + $0x510] ss:$8 sps:$4 sm:$0xff]  }
 0x115   : > { %1248 = vmatpush1.bf16.msra.mxu0 %v5288_v38  ;;  %v5453_v38 = vld [vmem:[#allocation8 + $0x24] ss:$16 sps:$4 sm:$0xff]  }
 0x116   : > { %1249 = vmatprep.subr.bf16.mxu0 %v5293_v39  ;;  %v5357_v39 = vld [vmem:[#allocation6 + $0x410] ss:$8 sps:$4 sm:$0xff]   ;;  %2221 = vmatprep.subr.bf16.mxu1 %v5453_v38  ;;  %v1328_v38 = vpack.c.bf16 %v1320_v32, %v1320_v32 }
 0x119   : > { %1250 = vmatpush1.bf16.msra.mxu0 %v5291_v40  ;;  %v5362_v40 = vld [vmem:[#allocation6 + $0x424] ss:$8 sps:$4 sm:$0xff]  }
 0x11a   : > { %1251 = vmatprep.subr.bf16.mxu0 %v5296_v41  ;;  %v5455_v41 = vld [vmem:[#allocation8 + $0x20] ss:$16 sps:$4 sm:$0xff]  }
 0x11b   : > { %2222 = vmatpush1.bf16.msra.mxu1 %v5455_v41 }
 0x11d   : > { %1252 = vmatpush1.bf16.msra.mxu0 %v5294_v42  ;;  %v5456_v42 = vld [vmem:[#allocation8 + $0x44] ss:$16 sps:$4 sm:$0xff]  }
 0x11e   : > { %1253 = vmatprep.subr.bf16.mxu0 %v5299_v43  ;;  %v5360_v43 = vld [vmem:[#allocation6 + $0x420] ss:$8 sps:$4 sm:$0xff]   ;;  %2223 = vmatprep.subr.bf16.mxu1 %v5456_v42  ;;  %v5404_v42 = vld [vmem:[#allocation6 + $0x504] ss:$8 sps:$4 sm:$0xff]  }
 0x121   : > { %1254 = vmatpush1.bf16.msra.mxu0 %v5297_v44  ;;  %v5365_v44 = vld [vmem:[#allocation6 + $0x434] ss:$8 sps:$4 sm:$0xff]  }
 0x122   : > { %1255 = vmatprep.subr.bf16.mxu0 %v5302_v45  ;;  %v5458_v45 = vld [vmem:[#allocation8 + $0x40] ss:$16 sps:$4 sm:$0xff]  }
 0x123   : > { %2224 = vmatpush1.bf16.msra.mxu1 %v5458_v45  ;;  %v5402_v45 = vld [vmem:[#allocation6 + $0x500] ss:$8 sps:$4 sm:$0xff]  }
 0x125   : > { %1256 = vmatpush1.bf16.msra.mxu0 %v5300_v46  ;;  %v5459_v46 = vld [vmem:[#allocation8 + $0x64] ss:$16 sps:$4 sm:$0xff]  }
 0x126   : > { %1257 = vmatprep.subr.bf16.mxu0 %v5305_v47  ;;  %v5363_v47 = vld [vmem:[#allocation6 + $0x430] ss:$8 sps:$4 sm:$0xff]   ;;  %2225 = vmatprep.subr.bf16.mxu1 %v5459_v46 }
 0x127   : > { %2226 = vmatpush1.bf16.msra.mxu1 %v5461_v50  ;;  %v5408_v50 = vld [vmem:[#allocation6 + $0x520] ss:$8 sps:$4 sm:$0xff]  }
 0x129   : > { %1258 = vmatpush1.bf16.msra.mxu0 %v5303_v48  ;;  %v5368_v48 = vld [vmem:[#allocation6 + $0x444] ss:$8 sps:$4 sm:$0xff]  }
 0x12a   : > { %1270 = vmatprep.subr.bf16.mxu0 %v5308_v51  ;;  %v5462_v51 = vld [vmem:[#allocation8 + $0x84] ss:$16 sps:$4 sm:$0xff]  }
 0x12b   : > { %2227 = vmatprep.subr.bf16.mxu1 %v5462_v51  ;;  %v5413_v51 = vld [vmem:[#allocation6 + $0x534] ss:$8 sps:$4 sm:$0xff]  }
 0x12c   : > { %1260 = vmatmul.mubr.bf16.vlgmr.msra.gmra.mrb[0].mxu0 %v299_v53  ;;  %v5371_v53 = vld [vmem:[#allocation6 + $0x454] ss:$8 sps:$4 sm:$0xff]  }
 0x12d   : > { %1271 = vmatpush1.bf16.msra.mxu0 %v5306_v54  ;;  %1302 = vmatprep.mubr.bf16.mxu0 %v302_v55  ;;  %v5464_v54 = vld [vmem:[#allocation8 + $0x80] ss:$16 sps:$4 sm:$0xff]   ;;  %v5465_v55 = vld [vmem:[#allocation8 + $0xa4] ss:$16 sps:$4 sm:$0xff]  }
 0x12e   : > { %1272 = vmatprep.subr.bf16.mxu0 %v5311_v56  ;;  %v5369_v56 = vld [vmem:[#allocation6 + $0x450] ss:$8 sps:$4 sm:$0xff]   ;;  %2228 = vmatpush1.bf16.msra.mxu1 %v5464_v54  ;;  %v5414_v54 = vld [vmem:[#allocation6 + $0x540] ss:$8 sps:$4 sm:$0xff]  }
 0x12f   : > { %2229 = vmatprep.subr.bf16.mxu1 %v5465_v55  ;;  %v5419_v55 = vld [vmem:[#allocation6 + $0x554] ss:$8 sps:$4 sm:$0xff]  }
 0x131   : > { %1273 = vmatpush1.bf16.msra.mxu0 %v5309_v57  ;;  %v5374_v57 = vld [vmem:[#allocation6 + $0x464] ss:$8 sps:$4 sm:$0xff]  }
 0x132   : > { %1274 = vmatprep.subr.bf16.mxu0 %v5314_v58  ;;  %v5467_v58 = vld [vmem:[#allocation8 + $0xa0] ss:$16 sps:$4 sm:$0xff]  }
 0x133   : > { %2230 = vmatpush1.bf16.msra.mxu1 %v5467_v58  ;;  %v5420_v58 = vld [vmem:[#allocation6 + $0x560] ss:$8 sps:$4 sm:$0xff]  }
 0x135   : > { %1275 = vmatpush1.bf16.msra.mxu0 %v5312_v59  ;;  %v5468_v59 = vld [vmem:[#allocation8 + $0xc4] ss:$16 sps:$4 sm:$0xff]  }
 0x136   : > { %1276 = vmatprep.subr.bf16.mxu0 %v5317_v60  ;;  %v5372_v60 = vld [vmem:[#allocation6 + $0x460] ss:$8 sps:$4 sm:$0xff]   ;;  %2231 = vmatprep.subr.bf16.mxu1 %v5468_v59  ;;  %v5425_v59 = vld [vmem:[#allocation6 + $0x574] ss:$8 sps:$4 sm:$0xff]  }
 0x139   : > { %1277 = vmatpush1.bf16.msra.mxu0 %v5315_v61  ;;  %v5377_v61 = vld [vmem:[#allocation6 + $0x474] ss:$8 sps:$4 sm:$0xff]  }
 0x13a   : > { %1278 = vmatprep.subr.bf16.mxu0 %v5320_v62  ;;  %v5470_v62 = vld [vmem:[#allocation8 + $0xc0] ss:$16 sps:$4 sm:$0xff]  }
 0x13b   : > { %2232 = vmatpush1.bf16.msra.mxu1 %v5470_v62  ;;  %v5426_v62 = vld [vmem:[#allocation6 + $0x580] ss:$8 sps:$4 sm:$0xff]  }
 0x13d   : > { %1279 = vmatpush1.bf16.msra.mxu0 %v5318_v63  ;;  %v5471_v63 = vld [vmem:[#allocation8 + $0xe4] ss:$16 sps:$4 sm:$0xff]  }
 0x13e   : > { %1280 = vmatprep.subr.bf16.mxu0 %v5323_v0  ;;  %v5375_v0 = vld [vmem:[#allocation6 + $0x470] ss:$8 sps:$4 sm:$0xff]   ;;  %2233 = vmatprep.subr.bf16.mxu1 %v5471_v63  ;;  %v5431_v63 = vld [vmem:[#allocation6 + $0x594] ss:$8 sps:$4 sm:$0xff]  }
 0x141   : > { %1281 = vmatpush1.bf16.msra.mxu0 %v5321_v1  ;;  %v5380_v1 = vld [vmem:[#allocation6 + $0x484] ss:$8 sps:$4 sm:$0xff]  }
 0x142   : > { %1282 = vmatprep.subr.bf16.mxu0 %v5326_v2  ;;  %v5473_v2 = vld [vmem:[#allocation8 + $0xe0] ss:$16 sps:$4 sm:$0xff]  }
 0x143   : > { %2234 = vmatpush1.bf16.msra.mxu1 %v5473_v2  ;;  %v5432_v2 = vld [vmem:[#allocation6 + $0x5a0] ss:$8 sps:$4 sm:$0xff]  }
 0x145   : > { %1283 = vmatpush1.bf16.msra.mxu0 %v5324_v3  ;;  %v5474_v3 = vld [vmem:[#allocation8 + $0x104] ss:$16 sps:$4 sm:$0xff]  }
 0x146   : > { %1284 = vmatprep.subr.bf16.mxu0 %v5329_v4  ;;  %v5378_v4 = vld [vmem:[#allocation6 + $0x480] ss:$8 sps:$4 sm:$0xff]   ;;  %2235 = vmatprep.subr.bf16.mxu1 %v5474_v3  ;;  %v5437_v3 = vld [vmem:[#allocation6 + $0x5b4] ss:$8 sps:$4 sm:$0xff]  }
 0x149   : > { %1285 = vmatpush1.bf16.msra.mxu0 %v5327_v5  ;;  %v5383_v5 = vld [vmem:[#allocation6 + $0x494] ss:$8 sps:$4 sm:$0xff]  }
 0x14a   : > { %1286 = vmatprep.subr.bf16.mxu0 %v5332_v6  ;;  %v5476_v6 = vld [vmem:[#allocation8 + $0x100] ss:$16 sps:$4 sm:$0xff]  }
 0x14b   : > { %2236 = vmatpush1.bf16.msra.mxu1 %v5476_v6  ;;  %v5438_v6 = vld [vmem:[#allocation6 + $0x5c0] ss:$8 sps:$4 sm:$0xff]  }
 0x14d   : > { %1287 = vmatpush1.bf16.msra.mxu0 %v5330_v8  ;;  %v5477_v8 = vld [vmem:[#allocation8 + $0x124] ss:$16 sps:$4 sm:$0xff]  }
 0x14e   : > { %1288 = vmatprep.subr.bf16.mxu0 %v5335_v9  ;;  %v5381_v9 = vld [vmem:[#allocation6 + $0x490] ss:$8 sps:$4 sm:$0xff]   ;;  %2237 = vmatprep.subr.bf16.mxu1 %v5477_v8  ;;  %v5443_v8 = vld [vmem:[#allocation6 + $0x5d4] ss:$8 sps:$4 sm:$0xff]  }
 0x151   : > { %1289 = vmatpush1.bf16.msra.mxu0 %v5333_v10  ;;  %v5386_v10 = vld [vmem:[#allocation6 + $0x4a4] ss:$8 sps:$4 sm:$0xff]  }
 0x152   : > { %1290 = vmatprep.subr.bf16.mxu0 %v5338_v11  ;;  %v5479_v11 = vld [vmem:[#allocation8 + $0x120] ss:$16 sps:$4 sm:$0xff]  }
 0x153   : > { %2238 = vmatpush1.bf16.msra.mxu1 %v5479_v11  ;;  %v1315_v11 = vld [vmem:[#allocation2 + $0x10] sm:$0xfc] }
 0x155   : > { %1291 = vmatpush1.bf16.msra.mxu0 %v5336_v12  ;;  %v5480_v12 = vld [vmem:[#allocation8 + $0x144] ss:$16 sps:$4 sm:$0xff]  }
 0x156   : > { %1292 = vmatprep.subr.bf16.mxu0 %v5341_v13  ;;  %v5384_v13 = vld [vmem:[#allocation6 + $0x4a0] ss:$8 sps:$4 sm:$0xff]   ;;  %2239 = vmatprep.subr.bf16.mxu1 %v5480_v12  ;;  %v1319_v12 = vld [vmem:[#allocation2 + $0x50] sm:$0x3] }
 0x159   : > { %1293 = vmatpush1.bf16.msra.mxu0 %v5339_v15  ;;  %v5389_v15 = vld [vmem:[#allocation6 + $0x4b4] ss:$8 sps:$4 sm:$0xff]  }
 0x15a   : > { %1294 = vmatprep.subr.bf16.mxu0 %v5344_v16  ;;  %v5482_v16 = vld [vmem:[#allocation8 + $0x140] ss:$16 sps:$4 sm:$0xff]  }
 0x15b   : > { %2240 = vmatpush1.bf16.msra.mxu1 %v5482_v16  ;;  %v1327_v16 = vpack.c.bf16 %v1319_v12, %v1319_v12  ;;  %v5558_v12 = vld [vmem:[#allocation6 + $0x840] ss:$8 sps:$4 sm:$0xff]  }
 0x15d   : > { %1295 = vmatpush1.bf16.msra.mxu0 %v5342_v17  ;;  %v5483_v17 = vld [vmem:[#allocation8 + $0x164] ss:$16 sps:$4 sm:$0xff]  }
 0x15e   : > { %1296 = vmatprep.subr.bf16.mxu0 %v5347_v18  ;;  %v5387_v18 = vld [vmem:[#allocation6 + $0x4b0] ss:$8 sps:$4 sm:$0xff]   ;;  %2241 = vmatprep.subr.bf16.mxu1 %v5483_v17  ;;  %v5449_v17 = vld [vmem:[#allocation6 + $0x5f4] ss:$8 sps:$4 sm:$0xff]  }
 0x161   : > { %1297 = vmatpush1.bf16.msra.mxu0 %v5345_v19  ;;  %v5392_v19 = vld [vmem:[#allocation6 + $0x4c4] ss:$8 sps:$4 sm:$0xff]  }
 0x162   : > { %1298 = vmatprep.subr.bf16.mxu0 %v5350_v20  ;;  %v5485_v20 = vld [vmem:[#allocation8 + $0x160] ss:$16 sps:$4 sm:$0xff]  }
 0x163   : > { %2242 = vmatpush1.bf16.msra.mxu1 %v5485_v20  ;;  %v1410_v20 = vrot.slane %v1327_v16, 1  ;;  %v5566_v16 = vld [vmem:[#allocation6 + $0x864] ss:$8 sps:$4 sm:$0xff]  }
 0x164   : > { %2243 = vmatprep.subr.bf16.mxu1 %v5486_v21 }
 0x165   : > { %1299 = vmatpush1.bf16.msra.mxu0 %v5348_v23  ;;  %v5395_v23 = vld [vmem:[#allocation6 + $0x4d4] ss:$8 sps:$4 sm:$0xff]  }
 0x166   : > { %1300 = vmatprep.subr.bf16.mxu0 %v5353_v24  ;;  %v5488_v24 = vld [vmem:[#allocation8 + $0x180] ss:$16 sps:$4 sm:$0xff]  }
 0x167   : > { %2244 = vmatpush1.bf16.msra.mxu1 %v5488_v24  ;;  %v5495_v24 = vld [vmem:[#allocation8 + $0x1e4] ss:$16 sps:$4 sm:$0xff]  }
 0x168   : > { %2245 = vmatprep.subr.bf16.mxu1 %v5489_v25  ;;  %v5497_v25 = vld [vmem:[#allocation8 + $0x1e0] ss:$16 sps:$4 sm:$0xff]  }
 0x169   : > { %1301 = vmatpush1.bf16.msra.mxu0 %v5351_v27  ;;  %v5398_v27 = vld [vmem:[#allocation6 + $0x4e4] ss:$8 sps:$4 sm:$0xff]  }
 0x16a   : > { %1739 = vmatprep.subr.bf16.mxu0 %v5356_v29  ;;  %v1317_v29 = vld [vmem:[#allocation2 + $0x40] sm:$0x3] }
 0x16c   : > { %1303 = vmatmul.mubr.bf16.vlgmr.msra.gmra.mrb[0].mxu0 %v301_v33  ;;  %v5491_v33 = vld [vmem:[#allocation8 + $0x1a0] ss:$16 sps:$4 sm:$0xff]  }
 0x16d   : > { %1740 = vmatpush1.bf16.msra.mxu0 %v5354_v34  ;;  %1771 = vmatprep.mubr.bf16.mxu0 %v1408_v36  ;;  %v5396_v34 = vld [vmem:[#allocation6 + $0x4e0] ss:$8 sps:$4 sm:$0xff]   ;;  %v1325_v36 = vpack.c.bf16 %v1317_v29, %v1317_v29 }
 0x16e   : > { %1741 = vmatprep.subr.bf16.mxu0 %v5359_v35  ;;  %v1321_v35 = vpack.c.bf16 %v6327_v49, %v1313_v28  ;;  %2246 = vmatpush1.bf16.msra.mxu1 %v5491_v33  ;;  %v5407_v49 = vld [vmem:[#allocation6 + $0x514] ss:$8 sps:$4 sm:$0xff]  }
 0x16f   : > { %v1404_v41 = vrot.slane %v1325_v36, 1 }
 0x171   : > { %1742 = vmatpush1.bf16.msra.mxu0 %v5357_v39  ;;  %v5399_v39 = vld [vmem:[#allocation6 + $0x4f0] ss:$8 sps:$4 sm:$0xff]  }
 0x172   : > { %1743 = vmatprep.subr.bf16.mxu0 %v5362_v40  ;;  %v1403_v40 = vrot.slane %v1321_v35, 1 }
 0x174   : > { %v1405_v46 = vsel %vm1402_vm3, %v1403_v40, %v1404_v41  ;;  %v5504_v40 = vld [vmem:[#allocation8 + $0x48] ss:$16 sps:$4 sm:$0xff]   ;;  %v5509_v41 = vld [vmem:[#allocation8 + $0x6c] ss:$16 sps:$4 sm:$0xff]  }
 0x175   : > { %1744 = vmatpush1.bf16.msra.mxu0 %v5360_v43  ;;  %v1412_v43 = vrot.slane %v1324_v30, 1  ;;  %v5503_v30 = vld [vmem:[#allocation8 + $0x2c] ss:$16 sps:$4 sm:$0xff]  }
 0x176   : > { %1745 = vmatprep.subr.bf16.mxu0 %v5365_v44  ;;  %v1413_v44 = vrot.slane %v1328_v38, 1  ;;  %v5501_v38 = vld [vmem:[#allocation8 + $0x28] ss:$16 sps:$4 sm:$0xff]  }
 0x179   : > { %1746 = vmatpush1.bf16.msra.mxu0 %v5363_v47  ;;  %v1414_v47 = vsel %vm1402_vm3, %v1412_v43, %v1413_v44  ;;  %v5512_v43 = vld [vmem:[#allocation8 + $0x8c] ss:$16 sps:$4 sm:$0xff]   ;;  %v5510_v44 = vld [vmem:[#allocation8 + $0x88] ss:$16 sps:$4 sm:$0xff]  }
 0x17a   : > { %1747 = vmatprep.subr.bf16.mxu0 %v5368_v48  ;;  %v5410_v48 = vld [vmem:[#allocation6 + $0x524] ss:$8 sps:$4 sm:$0xff]  }
 0x17d   : > { %1748 = vmatpush1.bf16.msra.mxu0 %v5366_v52  ;;  %v5411_v52 = vld [vmem:[#allocation6 + $0x530] ss:$8 sps:$4 sm:$0xff]  }
 0x17e   : > { %1749 = vmatprep.subr.bf16.mxu0 %v5371_v53  ;;  %v5416_v53 = vld [vmem:[#allocation6 + $0x544] ss:$8 sps:$4 sm:$0xff]  }
 0x181   : > { %1750 = vmatpush1.bf16.msra.mxu0 %v5369_v56  ;;  %v5417_v56 = vld [vmem:[#allocation6 + $0x550] ss:$8 sps:$4 sm:$0xff]  }
 0x182   : > { %1751 = vmatprep.subr.bf16.mxu0 %v5374_v57  ;;  %v5422_v57 = vld [vmem:[#allocation6 + $0x564] ss:$8 sps:$4 sm:$0xff]  }
 0x185   : > { %1752 = vmatpush1.bf16.msra.mxu0 %v5372_v60  ;;  %v5423_v60 = vld [vmem:[#allocation6 + $0x570] ss:$8 sps:$4 sm:$0xff]  }
 0x186   : > { %1753 = vmatprep.subr.bf16.mxu0 %v5377_v61  ;;  %v5428_v61 = vld [vmem:[#allocation6 + $0x584] ss:$8 sps:$4 sm:$0xff]  }
 0x189   : > { %1754 = vmatpush1.bf16.msra.mxu0 %v5375_v0  ;;  %v5429_v0 = vld [vmem:[#allocation6 + $0x590] ss:$8 sps:$4 sm:$0xff]  }
 0x18a   : > { %1755 = vmatprep.subr.bf16.mxu0 %v5380_v1  ;;  %v5434_v1 = vld [vmem:[#allocation6 + $0x5a4] ss:$8 sps:$4 sm:$0xff]  }
 0x18d   : > { %1756 = vmatpush1.bf16.msra.mxu0 %v5378_v4  ;;  %v5435_v4 = vld [vmem:[#allocation6 + $0x5b0] ss:$8 sps:$4 sm:$0xff]  }
 0x18e   : > { %1757 = vmatprep.subr.bf16.mxu0 %v5383_v5  ;;  %v5440_v5 = vld [vmem:[#allocation6 + $0x5c4] ss:$8 sps:$4 sm:$0xff]  }
 0x191   : > { %1758 = vmatpush1.bf16.msra.mxu0 %v5381_v9  ;;  %v5441_v9 = vld [vmem:[#allocation6 + $0x5d0] ss:$8 sps:$4 sm:$0xff]  }
 0x192   : > { %1759 = vmatprep.subr.bf16.mxu0 %v5386_v10  ;;  %v5446_v10 = vld [vmem:[#allocation6 + $0x5e4] ss:$8 sps:$4 sm:$0xff]  }
 0x195   : > { %1760 = vmatpush1.bf16.msra.mxu0 %v5384_v13  ;;  %v5444_v13 = vld [vmem:[#allocation6 + $0x5e0] ss:$8 sps:$4 sm:$0xff]  }
 0x196   : > { %1761 = vmatprep.subr.bf16.mxu0 %v5389_v15  ;;  %v1323_v15 = vpack.c.bf16 %v6335_v7, %v1315_v11  ;;  %v5500_v7 = vld [vmem:[#allocation8 + $0xc] ss:$16 sps:$4 sm:$0xff]  }
 0x197   : > { %v5560_v11 = vld [vmem:[#allocation6 + $0x844] ss:$8 sps:$4 sm:$0xff]  }
 0x199   : > { %1762 = vmatpush1.bf16.msra.mxu0 %v5387_v18  ;;  %v5447_v18 = vld [vmem:[#allocation6 + $0x5f0] ss:$8 sps:$4 sm:$0xff]  }
 0x19a   : > { %1763 = vmatprep.subr.bf16.mxu0 %v5392_v19  ;;  %v1409_v19 = vrot.slane %v1323_v15, 1  ;;  %v5561_v15 = vld [vmem:[#allocation6 + $0x850] ss:$8 sps:$4 sm:$0xff]  }
 0x19c   : > { %v1411_v21 = vsel %vm1402_vm3, %v1409_v19, %v1410_v20  ;;  %v5567_v19 = vld [vmem:[#allocation6 + $0x870] ss:$8 sps:$4 sm:$0xff]   ;;  %v5572_v20 = vld [vmem:[#allocation6 + $0x884] ss:$8 sps:$4 sm:$0xff]  }
 0x19d   : > { %1764 = vmatpush1.bf16.msra.mxu0 %v5390_v22  ;;  %v5492_v22 = vld [vmem:[#allocation8 + $0x1c4] ss:$16 sps:$4 sm:$0xff]  }
 0x19e   : > { %1765 = vmatprep.subr.bf16.mxu0 %v5395_v23  ;;  %v5494_v23 = vld [vmem:[#allocation8 + $0x1c0] ss:$16 sps:$4 sm:$0xff]   ;;  %2247 = vmatprep.subr.bf16.mxu1 %v5492_v22  ;;  %v5575_v22 = vld [vmem:[#allocation6 + $0x894] ss:$8 sps:$4 sm:$0xff]  }
 0x19f   : > { %2248 = vmatpush1.bf16.msra.mxu1 %v5494_v23  ;;  %v5573_v23 = vld [vmem:[#allocation6 + $0x890] ss:$8 sps:$4 sm:$0xff]  }
 0x1a0   : > { %2249 = vmatprep.subr.bf16.mxu1 %v5495_v24  ;;  %v5578_v24 = vld [vmem:[#allocation6 + $0x8a4] ss:$8 sps:$4 sm:$0xff]  }
 0x1a1   : > { %1766 = vmatpush1.bf16.msra.mxu0 %v5393_v26 }
 0x1a2   : > { %1767 = vmatprep.subr.bf16.mxu0 %v5398_v27 }
 0x1a3   : > { %2250 = vmatpush1.bf16.msra.mxu1 %v5497_v25  ;;  %v5576_v25 = vld [vmem:[#allocation6 + $0x8a0] ss:$8 sps:$4 sm:$0xff]  }
 0x1a4   : > { %2262 = vmatprep.subr.bf16.mxu1 %v5500_v7  ;;  %v5581_v7 = vld [vmem:[#allocation6 + $0x8b4] ss:$8 sps:$4 sm:$0xff]  }
 0x1a5   : > { %1768 = vmatpush1.bf16.msra.mxu0 %v5396_v34 }
 0x1a6   : > { %1769 = vmatprep.subr.bf16.mxu0 %v5401_v37  ;;  %v5498_v37 = vld [vmem:[#allocation8 + $0x8] ss:$16 sps:$4 sm:$0xff]  }
 0x1a9   : > { %1770 = vmatpush1.bf16.msra.mxu0 %v5399_v39  ;;  %v5506_v39 = vld [vmem:[#allocation8 + $0x4c] ss:$16 sps:$4 sm:$0xff]  }
 0x1aa   : > { %1782 = vmatprep.subr.bf16.mxu0 %v5404_v42  ;;  %v5507_v42 = vld [vmem:[#allocation8 + $0x68] ss:$16 sps:$4 sm:$0xff]  }
 0x1ac   : > { %1772 = vmatmul.mubr.bf16.vlgmr.msra.gmra.mrb[0].mxu0 %v1405_v46  ;;  %v5513_v46 = vld [vmem:[#allocation8 + $0xa8] ss:$16 sps:$4 sm:$0xff]  }
 0x1ad   : > { %1783 = vmatpush1.bf16.msra.mxu0 %v5402_v45  ;;  %1814 = vmatprep.mubr.bf16.mxu0 %v1414_v47  ;;  %v5515_v45 = vld [vmem:[#allocation8 + $0xac] ss:$16 sps:$4 sm:$0xff]   ;;  %v5516_v47 = vld [vmem:[#allocation8 + $0xc8] ss:$16 sps:$4 sm:$0xff]  }
 0x1ae   : > { %1784 = vmatprep.subr.bf16.mxu0 %v5407_v49  ;;  %v5518_v49 = vld [vmem:[#allocation8 + $0xcc] ss:$16 sps:$4 sm:$0xff]  }
 0x1b1   : > { %1785 = vmatpush1.bf16.msra.mxu0 %v5405_v14  ;;  %v5521_v14 = vld [vmem:[#allocation8 + $0xec] ss:$16 sps:$4 sm:$0xff]  }
 0x1b2   : > { %1786 = vmatprep.subr.bf16.mxu0 %v5410_v48  ;;  %v5519_v48 = vld [vmem:[#allocation8 + $0xe8] ss:$16 sps:$4 sm:$0xff]  }
 0x1b5   : > { %1787 = vmatpush1.bf16.msra.mxu0 %v5408_v50  ;;  %v5524_v50 = vld [vmem:[#allocation8 + $0x10c] ss:$16 sps:$4 sm:$0xff]  }
 0x1b6   : > { %1788 = vmatprep.subr.bf16.mxu0 %v5413_v51  ;;  %v5522_v51 = vld [vmem:[#allocation8 + $0x108] ss:$16 sps:$4 sm:$0xff]  }
 0x1b9   : > { %1789 = vmatpush1.bf16.msra.mxu0 %v5411_v52  ;;  %v5527_v52 = vld [vmem:[#allocation8 + $0x12c] ss:$16 sps:$4 sm:$0xff]  }
 0x1ba   : > { %1790 = vmatprep.subr.bf16.mxu0 %v5416_v53  ;;  %v5525_v53 = vld [vmem:[#allocation8 + $0x128] ss:$16 sps:$4 sm:$0xff]  }
 0x1bd   : > { %1791 = vmatpush1.bf16.msra.mxu0 %v5414_v54  ;;  %v5530_v54 = vld [vmem:[#allocation8 + $0x14c] ss:$16 sps:$4 sm:$0xff]  }
 0x1be   : > { %1792 = vmatprep.subr.bf16.mxu0 %v5419_v55  ;;  %v5528_v55 = vld [vmem:[#allocation8 + $0x148] ss:$16 sps:$4 sm:$0xff]  }
 0x1c1   : > { %1793 = vmatpush1.bf16.msra.mxu0 %v5417_v56  ;;  %v5533_v56 = vld [vmem:[#allocation8 + $0x16c] ss:$16 sps:$4 sm:$0xff]  }
 0x1c2   : > { %1794 = vmatprep.subr.bf16.mxu0 %v5422_v57  ;;  %v5531_v57 = vld [vmem:[#allocation8 + $0x168] ss:$16 sps:$4 sm:$0xff]  }
 0x1c5   : > { %1795 = vmatpush1.bf16.msra.mxu0 %v5420_v58  ;;  %v5536_v58 = vld [vmem:[#allocation8 + $0x18c] ss:$16 sps:$4 sm:$0xff]  }
 0x1c6   : > { %1796 = vmatprep.subr.bf16.mxu0 %v5425_v59  ;;  %v5534_v59 = vld [vmem:[#allocation8 + $0x188] ss:$16 sps:$4 sm:$0xff]  }
 0x1c9   : > { %1797 = vmatpush1.bf16.msra.mxu0 %v5423_v60  ;;  %v5539_v60 = vld [vmem:[#allocation8 + $0x1ac] ss:$16 sps:$4 sm:$0xff]  }
 0x1ca   : > { %1798 = vmatprep.subr.bf16.mxu0 %v5428_v61  ;;  %v5537_v61 = vld [vmem:[#allocation8 + $0x1a8] ss:$16 sps:$4 sm:$0xff]  }
 0x1cd   : > { %1799 = vmatpush1.bf16.msra.mxu0 %v5426_v62  ;;  %v5542_v62 = vld [vmem:[#allocation8 + $0x1cc] ss:$16 sps:$4 sm:$0xff]  }
 0x1ce   : > { %1800 = vmatprep.subr.bf16.mxu0 %v5431_v63  ;;  %v5540_v63 = vld [vmem:[#allocation8 + $0x1c8] ss:$16 sps:$4 sm:$0xff]  }
 0x1d1   : > { %1801 = vmatpush1.bf16.msra.mxu0 %v5429_v0  ;;  %v5545_v0 = vld [vmem:[#allocation8 + $0x1ec] ss:$16 sps:$4 sm:$0xff]  }
 0x1d2   : > { %1802 = vmatprep.subr.bf16.mxu0 %v5434_v1  ;;  %v5543_v1 = vld [vmem:[#allocation8 + $0x1e8] ss:$16 sps:$4 sm:$0xff]  }
 0x1d5   : > { %1803 = vmatpush1.bf16.msra.mxu0 %v5432_v2  ;;  %v5548_v2 = vld [vmem:[#allocation6 + $0x804] ss:$8 sps:$4 sm:$0xff]  }
 0x1d6   : > { %1804 = vmatprep.subr.bf16.mxu0 %v5437_v3  ;;  %v5546_v3 = vld [vmem:[#allocation6 + $0x800] ss:$8 sps:$4 sm:$0xff]  }
 0x1d9   : > { %1805 = vmatpush1.bf16.msra.mxu0 %v5435_v4  ;;  %v5551_v4 = vld [vmem:[#allocation6 + $0x814] ss:$8 sps:$4 sm:$0xff]  }
 0x1da   : > { %1806 = vmatprep.subr.bf16.mxu0 %v5440_v5  ;;  %v5549_v5 = vld [vmem:[#allocation6 + $0x810] ss:$8 sps:$4 sm:$0xff]  }
 0x1dd   : > { %1807 = vmatpush1.bf16.msra.mxu0 %v5438_v6  ;;  %v5554_v6 = vld [vmem:[#allocation6 + $0x824] ss:$8 sps:$4 sm:$0xff]  }
 0x1de   : > { %1808 = vmatprep.subr.bf16.mxu0 %v5443_v8  ;;  %v5552_v8 = vld [vmem:[#allocation6 + $0x820] ss:$8 sps:$4 sm:$0xff]  }
 0x1e1   : > { %1809 = vmatpush1.bf16.msra.mxu0 %v5441_v9  ;;  %v5557_v9 = vld [vmem:[#allocation6 + $0x834] ss:$8 sps:$4 sm:$0xff]  }
 0x1e2   : > { %1810 = vmatprep.subr.bf16.mxu0 %v5446_v10  ;;  %v5555_v10 = vld [vmem:[#allocation6 + $0x830] ss:$8 sps:$4 sm:$0xff]  }
 0x1e5   : > { %1811 = vmatpush1.bf16.msra.mxu0 %v5444_v13  ;;  %v5563_v13 = vld [vmem:[#allocation6 + $0x854] ss:$8 sps:$4 sm:$0xff]  }
 0x1e6   : > { %1812 = vmatprep.subr.bf16.mxu0 %v5449_v17  ;;  %v5564_v17 = vld [vmem:[#allocation6 + $0x860] ss:$8 sps:$4 sm:$0xff]  }
 0x1e9   : > { %1813 = vmatpush1.bf16.msra.mxu0 %v5447_v18  ;;  %v5569_v18 = vld [vmem:[#allocation6 + $0x874] ss:$8 sps:$4 sm:$0xff]  }
 0x1ec   : > { %1815 = vmatmul.mubr.bf16.vlgmr.msra.gmra.mrb[0].mxu0 %v1411_v21  ;;  %v5570_v21 = vld [vmem:[#allocation6 + $0x880] ss:$8 sps:$4 sm:$0xff]  }
 0x2bf   : > { %v1816_v26 = vpop.f32.mrb[0].mxu0 }
 0x2c0   : > { %v1818_v27 = vpop.f32.mrb[1].mxu0  ;;  %v1829_v29 = vmax.f32 %v1816_v26, 0.0  ;;  %v5579_v26 = vld [vmem:[#allocation6 + $0x8b0] ss:$8 sps:$4 sm:$0xff]  }
 0x2c1   : > { %v1820_v28 = vpop.f32.mrb[2].mxu0  ;;  %v1830_v33 = vmax.f32 %v1818_v27, 0.0  ;;  %v5584_v27 = vld [vmem:[#allocation6 + $0x8c4] ss:$8 sps:$4 sm:$0xff]  }
 0x2c2   : > { %v1831_v31 = vmax.f32 %v1820_v28, 0.0  ;;  %v1822_v32 = vpop.f32.mrb[3].mxu0  ;;  %v5582_v28 = vld [vmem:[#allocation6 + $0x8c0] ss:$8 sps:$4 sm:$0xff]  }
 0x2c3   : > { %v1832_v34 = vmax.f32 %v1822_v32, 0.0  ;;  %v5590_v32 = vld [vmem:[#allocation6 + $0x8e4] ss:$8 sps:$4 sm:$0xff]  }
 0x2c4   : > { %v6357_v35 = vpack.c.bf16 %v1831_v31, %v1829_v29  ;;  %v5587_v29 = vld [vmem:[#allocation6 + $0x8d4] ss:$8 sps:$4 sm:$0xff]   ;;  %v5585_v31 = vld [vmem:[#allocation6 + $0x8d0] ss:$8 sps:$4 sm:$0xff]  }
 0x2c5   : > { %v1834_v36 = vpack.c.bf16 %v1832_v34, %v1830_v33  ;;  %v5588_v33 = vld [vmem:[#allocation6 + $0x8e0] ss:$8 sps:$4 sm:$0xff]   ;;  %v5593_v34 = vld [vmem:[#allocation6 + $0x8f4] ss:$8 sps:$4 sm:$0xff]  }
 0x2c7   : > { %2251 = vmatprep.mubr.bf16.mxu1 %v1834_v36 }
 0x2c8   : > { %2252 = vmatmul.mubr.bf16.vlgmr.msra.gmra.mrb[0].mxu1 %v6357_v35 }
 0x2c9   : > { %2263 = vmatpush1.bf16.msra.mxu1 %v5498_v37  ;;  %2294 = vmatprep.mubr.bf16.mxu1 %v1834_v36  ;;  %v5596_v36 = vld [vmem:[#allocation6 + $0x904] ss:$8 sps:$4 sm:$0xff]  }
 0x2ca   : > { %2264 = vmatprep.subr.bf16.mxu1 %v5503_v30  ;;  %v5930_v30 = vld [vmem:[%s6307_s5] sm:$0xff] }
 0x2cd   : > { %2265 = vmatpush1.bf16.msra.mxu1 %v5501_v38 }
 0x2ce   : > { %2266 = vmatprep.subr.bf16.mxu1 %v5506_v39 }
 0x2d1   : > { %2267 = vmatpush1.bf16.msra.mxu1 %v5504_v40  ;;  %v5931_v40 = vld [vmem:[%s6307_s5 + $0x8] sm:$0xff] }
 0x2d2   : > { %2268 = vmatprep.subr.bf16.mxu1 %v5509_v41 }
 0x2d5   : > { %2269 = vmatpush1.bf16.msra.mxu1 %v5507_v42 }
 0x2d6   : > { %2270 = vmatprep.subr.bf16.mxu1 %v5512_v43 }
 0x2d9   : > { %2271 = vmatpush1.bf16.msra.mxu1 %v5510_v44  ;;  %v5932_v44 = vld [vmem:[%s6307_s5 + $0x20] sm:$0xff] }
 0x2da   : > { %2272 = vmatprep.subr.bf16.mxu1 %v5515_v45 }
 0x2dd   : > { %2273 = vmatpush1.bf16.msra.mxu1 %v5513_v46 }
 0x2de   : > { %2274 = vmatprep.subr.bf16.mxu1 %v5518_v49 }
 0x2e1   : > { %2275 = vmatpush1.bf16.msra.mxu1 %v5516_v47  ;;  %v5933_v47 = vld [vmem:[%s6307_s5 + $0x28] sm:$0xff] }
 0x2e2   : > { %2276 = vmatprep.subr.bf16.mxu1 %v5521_v14 }
 0x2e5   : > { %2277 = vmatpush1.bf16.msra.mxu1 %v5519_v48 }
 0x2e6   : > { %2278 = vmatprep.subr.bf16.mxu1 %v5524_v50 }
 0x2e9   : > { %2279 = vmatpush1.bf16.msra.mxu1 %v5522_v51 }
 0x2ea   : > { %2280 = vmatprep.subr.bf16.mxu1 %v5527_v52 }
 0x2ed   : > { %2281 = vmatpush1.bf16.msra.mxu1 %v5525_v53 }
 0x2ee   : > { %2282 = vmatprep.subr.bf16.mxu1 %v5530_v54 }
 0x2f1   : > { %2283 = vmatpush1.bf16.msra.mxu1 %v5528_v55 }
 0x2f2   : > { %2284 = vmatprep.subr.bf16.mxu1 %v5533_v56 }
 0x2f5   : > { %2285 = vmatpush1.bf16.msra.mxu1 %v5531_v57 }
 0x2f6   : > { %2286 = vmatprep.subr.bf16.mxu1 %v5536_v58 }
 0x2f9   : > { %2287 = vmatpush1.bf16.msra.mxu1 %v5534_v59 }
 0x2fa   : > { %2288 = vmatprep.subr.bf16.mxu1 %v5539_v60 }
 0x2fd   : > { %2289 = vmatpush1.bf16.msra.mxu1 %v5537_v61 }
 0x2fe   : > { %2290 = vmatprep.subr.bf16.mxu1 %v5542_v62 }
 0x301   : > { %2291 = vmatpush1.bf16.msra.mxu1 %v5540_v63 }
 0x302   : > { %2292 = vmatprep.subr.bf16.mxu1 %v5545_v0 }
 0x305   : > { %2293 = vmatpush1.bf16.msra.mxu1 %v5543_v1 }
 0x306   : > { %2895 = vmatprep.subr.bf16.mxu1 %v5548_v2 }
 0x308   : > { %2295 = vmatmul.mubr.bf16.vlgmr.msra.gmra.mrb[4].mxu1 %v6357_v35  ;;  %v5591_v35 = vld [vmem:[#allocation6 + $0x8f0] ss:$8 sps:$4 sm:$0xff]  }
 0x309   : > { %2896 = vmatpush1.bf16.msra.mxu1 %v5546_v3 }
 0x30a   : > { %2897 = vmatprep.subr.bf16.mxu1 %v5551_v4 }
 0x30d   : > { %2898 = vmatpush1.bf16.msra.mxu1 %v5549_v5 }
 0x30e   : > { %2899 = vmatprep.subr.bf16.mxu1 %v5554_v6 }
 0x311   : > { %2900 = vmatpush1.bf16.msra.mxu1 %v5552_v8 }
 0x312   : > { %2901 = vmatprep.subr.bf16.mxu1 %v5557_v9 }
 0x315   : > { %2902 = vmatpush1.bf16.msra.mxu1 %v5555_v10 }
 0x316   : > { %2903 = vmatprep.subr.bf16.mxu1 %v5560_v11 }
 0x319   : > { %2904 = vmatpush1.bf16.msra.mxu1 %v5558_v12 }
 0x31a   : > { %2905 = vmatprep.subr.bf16.mxu1 %v5563_v13 }
 0x31d   : > { %2906 = vmatpush1.bf16.msra.mxu1 %v5561_v15  ;;  %v5594_v15 = vld [vmem:[#allocation6 + $0x900] ss:$8 sps:$4 sm:$0xff]  }
 0x31e   : > { %2907 = vmatprep.subr.bf16.mxu1 %v5566_v16 }
 0x321   : > { %2908 = vmatpush1.bf16.msra.mxu1 %v5564_v17  ;;  %v5599_v17 = vld [vmem:[#allocation6 + $0x914] ss:$8 sps:$4 sm:$0xff]  }
 0x322   : > { %2909 = vmatprep.subr.bf16.mxu1 %v5569_v18 }
 0x325   : > { %2910 = vmatpush1.bf16.msra.mxu1 %v5567_v19  ;;  %v5597_v19 = vld [vmem:[#allocation6 + $0x910] ss:$8 sps:$4 sm:$0xff]  }
 0x326   : > { %2911 = vmatprep.subr.bf16.mxu1 %v5572_v20  ;;  %v5602_v20 = vld [vmem:[#allocation6 + $0x924] ss:$8 sps:$4 sm:$0xff]  }
 0x329   : > { %2912 = vmatpush1.bf16.msra.mxu1 %v5570_v21  ;;  %v5600_v21 = vld [vmem:[#allocation6 + $0x920] ss:$8 sps:$4 sm:$0xff]  }
 0x32a   : > { %2913 = vmatprep.subr.bf16.mxu1 %v5575_v22  ;;  %v5605_v22 = vld [vmem:[#allocation6 + $0x934] ss:$8 sps:$4 sm:$0xff]  }
 0x32d   : > { %2914 = vmatpush1.bf16.msra.mxu1 %v5573_v23  ;;  %v5603_v23 = vld [vmem:[#allocation6 + $0x930] ss:$8 sps:$4 sm:$0xff]  }
 0x32e   : > { %2915 = vmatprep.subr.bf16.mxu1 %v5578_v24  ;;  %v5608_v24 = vld [vmem:[#allocation6 + $0x944] ss:$8 sps:$4 sm:$0xff]  }
 0x331   : > { %2916 = vmatpush1.bf16.msra.mxu1 %v5576_v25  ;;  %v5606_v25 = vld [vmem:[#allocation6 + $0x940] ss:$8 sps:$4 sm:$0xff]  }
 0x332   : > { %2917 = vmatprep.subr.bf16.mxu1 %v5581_v7  ;;  %v5611_v7 = vld [vmem:[#allocation6 + $0x954] ss:$8 sps:$4 sm:$0xff]  }
 0x335   : > { %2918 = vmatpush1.bf16.msra.mxu1 %v5579_v26  ;;  %v5609_v26 = vld [vmem:[#allocation6 + $0x950] ss:$8 sps:$4 sm:$0xff]  }
 0x336   : > { %2919 = vmatprep.subr.bf16.mxu1 %v5584_v27  ;;  %v5614_v27 = vld [vmem:[#allocation6 + $0x964] ss:$8 sps:$4 sm:$0xff]  }
 0x339   : > { %2920 = vmatpush1.bf16.msra.mxu1 %v5582_v28  ;;  %v5612_v28 = vld [vmem:[#allocation6 + $0x960] ss:$8 sps:$4 sm:$0xff]  }
 0x33a   : > { %2921 = vmatprep.subr.bf16.mxu1 %v5587_v29  ;;  %v5617_v29 = vld [vmem:[#allocation6 + $0x974] ss:$8 sps:$4 sm:$0xff]  }
 0x33d   : > { %2922 = vmatpush1.bf16.msra.mxu1 %v5585_v31  ;;  %v5615_v31 = vld [vmem:[#allocation6 + $0x970] ss:$8 sps:$4 sm:$0xff]  }
 0x33e   : > { %2923 = vmatprep.subr.bf16.mxu1 %v5590_v32  ;;  %v5620_v32 = vld [vmem:[#allocation6 + $0x984] ss:$8 sps:$4 sm:$0xff]  }
 0x341   : > { %2924 = vmatpush1.bf16.msra.mxu1 %v5588_v33  ;;  %v5618_v33 = vld [vmem:[#allocation6 + $0x980] ss:$8 sps:$4 sm:$0xff]  }
 0x342   : > { %2925 = vmatprep.subr.bf16.mxu1 %v5593_v34  ;;  %v5623_v34 = vld [vmem:[#allocation6 + $0x994] ss:$8 sps:$4 sm:$0xff]  }
 0x345   : > { %2926 = vmatpush1.bf16.msra.mxu1 %v5591_v35  ;;  %v5621_v35 = vld [vmem:[#allocation6 + $0x990] ss:$8 sps:$4 sm:$0xff]  }
 0x346   : > { %2938 = vmatprep.subr.bf16.mxu1 %v5596_v36  ;;  %v5626_v36 = vld [vmem:[#allocation6 + $0x9a4] ss:$8 sps:$4 sm:$0xff]  }
 0x39b   : > { %v2253_v37 = vpop.f32.mrb[0].mxu1 }
 0x39c   : > { %v6362_v38 = vadd.f32 %v5930_v30, %v2253_v37  ;;  %v2255_v39 = vpop.f32.mrb[1].mxu1  ;;  %v5624_v37 = vld [vmem:[#allocation6 + $0x9a0] ss:$8 sps:$4 sm:$0xff]  }
 0x39d   : > { %v6365_v41 = vadd.f32 %v5931_v40, %v2255_v39  ;;  %v2257_v42 = vpop.f32.mrb[2].mxu1  ;;  %v5629_v39 = vld [vmem:[#allocation6 + $0x9b4] ss:$8 sps:$4 sm:$0xff]  }
 0x39e   : > { %v2313_v43 = vmax.f32 %v6362_v38, 0.0  ;;  %v6369_v45 = vadd.f32 %v5932_v44, %v2257_v42  ;;  %v2259_v46 = vpop.f32.mrb[3].mxu1  ;;  %v5934_v40 = vld [vmem:[%s6307_s5 + $0x10] sm:$0xff]  ;;  %v5935_v44 = vld [vmem:[%s6307_s5 + $0x18] sm:$0xff] }
 0x39f   : > { %v2314_v49 = vmax.f32 %v6365_v41, 0.0  ;;  %v6373_v14 = vadd.f32 %v5933_v47, %v2259_v46 }
 0x3a0   : > { %v2329_v48 = vrot.slane %v2313_v43, 7  ;;  %v2317_v50 = vmax.f32 %v6369_v45, 0.0 }
 0x3a1   : > { %v2330_v51 = vrot.slane %v2314_v49, 7  ;;  %v2318_v52 = vmax.f32 %v6373_v14, 0.0 }
 0x3a2   : > { %2353 = vst [vmem:[#allocation2] sm:$0xfe] %v2329_v48  ;;  %v2333_v53 = vrot.slane %v2317_v50, 7 }
 0x3a3   : > { %2354 = vst [vmem:[#allocation2 + $0x8] sm:$0xfe] %v2330_v51  ;;  %v2335_v54 = vrot.slane %v2318_v52, 7  ;;  %v5627_v52 = vld [vmem:[#allocation6 + $0x9b0] ss:$8 sps:$4 sm:$0xff]  }
 0x3a4   : > { %v6378_v55 = vsel %vm254_vm0, %v2329_v48, %v2333_v53  ;;  %2361 = vst [vmem:[#allocation2 + $0x40] sm:$0x1] %v2333_v53  ;;  %v5936_v48 = vld [vmem:[%s6307_s5 + $0x30] sm:$0xff] }
 0x3a5   : > { %v6381_v56 = vsel %vm254_vm0, %v2330_v51, %v2335_v54  ;;  %2362 = vst [vmem:[#allocation2 + $0x48] sm:$0x1] %v2335_v54  ;;  %v5937_v54 = vld [vmem:[%s6307_s5 + $0x38] sm:$0xff] }
 0x3a9   : > { %v2442_v57 = vld [vmem:[#allocation2] sm:$0xfe] }
 0x3aa   : > { %v2443_v58 = vld [vmem:[#allocation2 + $0x8] sm:$0xfe]  ;;  %v2450_v59 = vpack.c.bf16 %v6378_v55, %v2442_v57 }
 0x3ab   : > { %v2451_v60 = vpack.c.bf16 %v6381_v56, %v2443_v58  ;;  %v2446_v61 = vld [vmem:[#allocation2 + $0x40] sm:$0x1]  ;;  %v5632_v58 = vld [vmem:[#allocation6 + $0x9c4] ss:$8 sps:$4 sm:$0xff]  }
 0x3ac   : > { %v2447_v62 = vld [vmem:[#allocation2 + $0x48] sm:$0x1]  ;;  %v2454_v63 = vpack.c.bf16 %v2446_v61, %v2446_v61  ;;  %v2526_v0 = vshll.u32 %v2450_v59, 16  ;;  %v2524_v3 = vshrl.u32 %v2450_v59, 16 }
 0x3ad   : > { %v2455_v1 = vpack.c.bf16 %v2447_v62, %v2447_v62  ;;  %v2538_v2 = vshll.u32 %v2451_v60, 16  ;;  %v2536_v6 = vshrl.u32 %v2451_v60, 16 }
 0x3ae   : > { %v2528_v4 = vrot.slane %v2526_v0, 1  ;;  %v2531_v5 = vshll.u32 %v2454_v63, 16  ;;  %v5630_v0 = vld [vmem:[#allocation6 + $0x9c0] ss:$8 sps:$4 sm:$0xff]  }
 0x3af   : > { %v2540_v8 = vrot.slane %v2538_v2, 1  ;;  %v2543_v9 = vshll.u32 %v2455_v1, 16  ;;  %v5635_v2 = vld [vmem:[#allocation6 + $0x9d4] ss:$8 sps:$4 sm:$0xff]  }
 0x3b0   : > { %v2529_v10 = vor.u32 %v2528_v4, %v2524_v3  ;;  %v2533_v11 = vrot.slane %v2531_v5, 1  ;;  %v5633_v5 = vld [vmem:[#allocation6 + $0x9d0] ss:$8 sps:$4 sm:$0xff]  }
 0x3b1   : > { %v2541_v12 = vor.u32 %v2540_v8, %v2536_v6  ;;  %v2545_v13 = vrot.slane %v2543_v9, 1  ;;  %v5638_v6 = vld [vmem:[#allocation6 + $0x9e4] ss:$8 sps:$4 sm:$0xff]   ;;  %v5636_v9 = vld [vmem:[#allocation6 + $0x9e0] ss:$8 sps:$4 sm:$0xff]  }
 0x3b2   : > { %v2534_v18 = vsel %vm448_vm1, %v2529_v10, %v2533_v11 }
 0x3b3   : > { %v2546_v16 = vsel %vm448_vm1, %v2541_v12, %v2545_v13  ;;  %v5641_v12 = vld [vmem:[#allocation6 + $0x9f4] ss:$8 sps:$4 sm:$0xff]  }
 0x3b4   : > { %2927 = vmatprep.mubr.bf16.mxu1 %v2546_v16 }
 0x3b5   : > { %2928 = vmatmul.mubr.bf16.vlgmr.msra.gmra.mrb[8].mxu1 %v2534_v18 }
 0x3b6   : > { %2939 = vmatpush1.bf16.msra.mxu1 %v5594_v15 }
 0x3b7   : > { %2940 = vmatprep.subr.bf16.mxu1 %v5599_v17 }
 0x3ba   : > { %2941 = vmatpush1.bf16.msra.mxu1 %v5597_v19 }
 0x3bb   : > { %2942 = vmatprep.subr.bf16.mxu1 %v5602_v20 }
 0x3be   : > { %2943 = vmatpush1.bf16.msra.mxu1 %v5600_v21  ;;  %v5639_v21 = vld [vmem:[#allocation6 + $0x9f0] ss:$8 sps:$4 sm:$0xff]  }
 0x3bf   : > { %2944 = vmatprep.subr.bf16.mxu1 %v5605_v22 }
 0x3c2   : > { %2945 = vmatpush1.bf16.msra.mxu1 %v5603_v23 }
 0x3c3   : > { %2946 = vmatprep.subr.bf16.mxu1 %v5608_v24 }
 0x3c6   : > { %2947 = vmatpush1.bf16.msra.mxu1 %v5606_v25 }
 0x3c7   : > { %2948 = vmatprep.subr.bf16.mxu1 %v5611_v7 }
 0x3ca   : > { %2949 = vmatpush1.bf16.msra.mxu1 %v5609_v26 }
 0x3cb   : > { %2950 = vmatprep.subr.bf16.mxu1 %v5614_v27  ;;  %v5644_v27 = vld [vmem:[#allocation6 + $0x604] ss:$8 sps:$4 sm:$0xff]  }
 0x3ce   : > { %2951 = vmatpush1.bf16.msra.mxu1 %v5612_v28 }
 0x3cf   : > { %2952 = vmatprep.subr.bf16.mxu1 %v5617_v29 }
 0x3d2   : > { %2953 = vmatpush1.bf16.msra.mxu1 %v5615_v31 }
 0x3d3   : > { %2954 = vmatprep.subr.bf16.mxu1 %v5620_v32 }
 0x3d6   : > { %2955 = vmatpush1.bf16.msra.mxu1 %v5618_v33  ;;  %v2366_v33 = vld [vmem:[#allocation2 + $0x8] sm:$0xff] }
 0x3d7   : > { %2956 = vmatprep.subr.bf16.mxu1 %v5623_v34  ;;  %v5642_v34 = vld [vmem:[#allocation6 + $0x600] ss:$8 sps:$4 sm:$0xff]  }
 0x3da   : > { %2957 = vmatpush1.bf16.msra.mxu1 %v5621_v35 }
 0x3db   : > { %v2296_v30 = vpop.f32.mrb[4].mxu1  ;;  %2958 = vmatprep.subr.bf16.mxu1 %v5626_v36  ;;  %v5647_v36 = vld [vmem:[#allocation6 + $0x614] ss:$8 sps:$4 sm:$0xff]  }
 0x3dc   : > { %v6388_v42 = vadd.f32 %v5934_v40, %v2296_v30  ;;  %v2298_v43 = vpop.f32.mrb[5].mxu1  ;;  %v2374_v30 = vpack.c.bf16 %v6381_v56, %v2366_v33  ;;  %v5650_v40 = vld [vmem:[#allocation6 + $0x624] ss:$8 sps:$4 sm:$0xff]   ;;  %v5708_v33 = vld [vmem:[#allocation6 + $0x760] ss:$8 sps:$4 sm:$0xff]  }
 0x3dd   : > { %v6391_v46 = vadd.f32 %v5935_v44, %v2298_v43  ;;  %v2300_v49 = vpop.f32.mrb[6].mxu1  ;;  %v5648_v43 = vld [vmem:[#allocation6 + $0x620] ss:$8 sps:$4 sm:$0xff]   ;;  %v5653_v44 = vld [vmem:[#allocation6 + $0x634] ss:$8 sps:$4 sm:$0xff]  }
 0x3de   : > { %v2315_v47 = vmax.f32 %v6388_v42, 0.0  ;;  %v6395_v50 = vadd.f32 %v5936_v48, %v2300_v49  ;;  %v2302_v51 = vpop.f32.mrb[7].mxu1  ;;  %2959 = vmatpush1.bf16.msra.mxu1 %v5624_v37  ;;  %v5651_v49 = vld [vmem:[#allocation6 + $0x630] ss:$8 sps:$4 sm:$0xff]   ;;  %v5654_v48 = vld [vmem:[#allocation6 + $0x640] ss:$8 sps:$4 sm:$0xff]  }
 0x3df   : > { %v2316_v53 = vmax.f32 %v6391_v46, 0.0  ;;  %v6399_v57 = vadd.f32 %v5937_v54, %v2302_v51  ;;  %2960 = vmatprep.subr.bf16.mxu1 %v5629_v39  ;;  %v5645_v39 = vld [vmem:[#allocation6 + $0x610] ss:$8 sps:$4 sm:$0xff]   ;;  %v5659_v51 = vld [vmem:[#allocation6 + $0x654] ss:$8 sps:$4 sm:$0xff]  }
 0x3e0   : > { %v2331_v59 = vrot.slane %v2315_v47, 7  ;;  %v2319_v60 = vmax.f32 %v6395_v50, 0.0  ;;  %v5656_v47 = vld [vmem:[#allocation6 + $0x644] ss:$8 sps:$4 sm:$0xff]   ;;  %v5660_v54 = vld [vmem:[#allocation6 + $0x660] ss:$8 sps:$4 sm:$0xff]  }
 0x3e1   : > { %v2332_v61 = vrot.slane %v2316_v53, 7  ;;  %v2320_v62 = vmax.f32 %v6399_v57, 0.0  ;;  %v5662_v53 = vld [vmem:[#allocation6 + $0x664] ss:$8 sps:$4 sm:$0xff]  }
 0x3e2   : > { %2355 = vst [vmem:[#allocation2 + $0x10] sm:$0xfe] %v2331_v59  ;;  %v2337_v63 = vrot.slane %v2319_v60, 7  ;;  %2961 = vmatpush1.bf16.msra.mxu1 %v5627_v52  ;;  %v5657_v52 = vld [vmem:[#allocation6 + $0x650] ss:$8 sps:$4 sm:$0xff]  }
 0x3e3   : > { %2356 = vst [vmem:[#allocation2 + $0x18] sm:$0xfe] %v2332_v61  ;;  %v2339_v1 = vrot.slane %v2320_v62, 7  ;;  %2962 = vmatprep.subr.bf16.mxu1 %v5632_v58  ;;  %v5665_v58 = vld [vmem:[#allocation6 + $0x674] ss:$8 sps:$4 sm:$0xff]  }
 0x3e4   : > { %v6404_v3 = vsel %vm254_vm0, %v2331_v59, %v2337_v63  ;;  %2363 = vst [vmem:[#allocation2 + $0x50] sm:$0x1] %v2337_v63  ;;  %v5663_v59 = vld [vmem:[#allocation6 + $0x670] ss:$8 sps:$4 sm:$0xff]   ;;  %v5668_v60 = vld [vmem:[#allocation6 + $0x684] ss:$8 sps:$4 sm:$0xff]  }
 0x3e5   : > { %v6407_v4 = vsel %vm254_vm0, %v2332_v61, %v2339_v1  ;;  %2364 = vst [vmem:[#allocation2 + $0x58] sm:$0x1] %v2339_v1  ;;  %v5666_v61 = vld [vmem:[#allocation6 + $0x680] ss:$8 sps:$4 sm:$0xff]   ;;  %v5671_v62 = vld [vmem:[#allocation6 + $0x694] ss:$8 sps:$4 sm:$0xff]  }
 0x3e6   : > { %2963 = vmatpush1.bf16.msra.mxu1 %v5630_v0  ;;  %v5669_v63 = vld [vmem:[#allocation6 + $0x690] ss:$8 sps:$4 sm:$0xff]   ;;  %v5674_v0 = vld [vmem:[#allocation6 + $0x6a4] ss:$8 sps:$4 sm:$0xff]   ;;  %v5672_v1 = vld [vmem:[#allocation6 + $0x6a0] ss:$8 sps:$4 sm:$0xff]  }
 0x3e7   : > { %2964 = vmatprep.subr.bf16.mxu1 %v5635_v2  ;;  %v5677_v2 = vld [vmem:[#allocation6 + $0x6b4] ss:$8 sps:$4 sm:$0xff]  }
 0x3e9   : > { %v2444_v8 = vld [vmem:[#allocation2 + $0x10] sm:$0xfe] }
 0x3ea   : > { %2965 = vmatpush1.bf16.msra.mxu1 %v5633_v5  ;;  %v2445_v10 = vld [vmem:[#allocation2 + $0x18] sm:$0xfe]  ;;  %v2452_v11 = vpack.c.bf16 %v6404_v3, %v2444_v8  ;;  %v5678_v8 = vld [vmem:[#allocation6 + $0x6c0] ss:$8 sps:$4 sm:$0xff]  }
 0x3eb   : > { %2966 = vmatprep.subr.bf16.mxu1 %v5638_v6  ;;  %v2453_v13 = vpack.c.bf16 %v6407_v4, %v2445_v10  ;;  %v2448_v15 = vld [vmem:[#allocation2 + $0x50] sm:$0x1]  ;;  %v5680_v6 = vld [vmem:[#allocation6 + $0x6c4] ss:$8 sps:$4 sm:$0xff]  }
 0x3ec   : > { %v2449_v16 = vld [vmem:[#allocation2 + $0x58] sm:$0x1]  ;;  %v2456_v17 = vpack.c.bf16 %v2448_v15, %v2448_v15  ;;  %v2550_v18 = vshll.u32 %v2452_v11, 16  ;;  %v2548_v22 = vshrl.u32 %v2452_v11, 16  ;;  %v5686_v11 = vld [vmem:[#allocation6 + $0x6e4] ss:$8 sps:$4 sm:$0xff]  }
 0x3ed   : > { %v2457_v19 = vpack.c.bf16 %v2449_v16, %v2449_v16  ;;  %v2562_v20 = vshll.u32 %v2453_v13, 16  ;;  %v2560_v25 = vshrl.u32 %v2453_v13, 16  ;;  %v5675_v5 = vld [vmem:[#allocation6 + $0x6b0] ss:$8 sps:$4 sm:$0xff]   ;;  %v5689_v13 = vld [vmem:[#allocation6 + $0x6f4] ss:$8 sps:$4 sm:$0xff]  }
 0x3ee   : > { %2967 = vmatpush1.bf16.msra.mxu1 %v5636_v9  ;;  %v2552_v23 = vrot.slane %v2550_v18, 1  ;;  %v2555_v24 = vshll.u32 %v2456_v17, 16  ;;  %v5683_v9 = vld [vmem:[#allocation6 + $0x6d4] ss:$8 sps:$4 sm:$0xff]   ;;  %v5681_v10 = vld [vmem:[#allocation6 + $0x6d0] ss:$8 sps:$4 sm:$0xff]  }
 0x3ef   : > { %2968 = vmatprep.subr.bf16.mxu1 %v5641_v12  ;;  %v2564_v7 = vrot.slane %v2562_v20, 1  ;;  %v2567_v26 = vshll.u32 %v2457_v19, 16  ;;  %v5684_v12 = vld [vmem:[#allocation6 + $0x6e0] ss:$8 sps:$4 sm:$0xff]   ;;  %v5687_v15 = vld [vmem:[#allocation6 + $0x6f0] ss:$8 sps:$4 sm:$0xff]  }
 0x3f0   : > { %v2553_v28 = vor.u32 %v2552_v23, %v2548_v22  ;;  %v2557_v29 = vrot.slane %v2555_v24, 1  ;;  %v5692_v16 = vld [vmem:[#allocation6 + $0x704] ss:$8 sps:$4 sm:$0xff]   ;;  %v2368_v18 = vld [vmem:[#allocation2 + $0x18] sm:$0xff]  ;;  %v5690_v19 = vld [vmem:[#allocation6 + $0x700] ss:$8 sps:$4 sm:$0xff]  }
 0x3f1   : > { %v2565_v31 = vor.u32 %v2564_v7, %v2560_v25  ;;  %v2569_v32 = vrot.slane %v2567_v26, 1  ;;  %v2365_v17 = vld [vmem:[#allocation2] sm:$0xff]  ;;  %v2376_v22 = vpack.c.bf16 %v6407_v4, %v2368_v18  ;;  %v5693_v23 = vld [vmem:[#allocation6 + $0x710] ss:$8 sps:$4 sm:$0xff]   ;;  %v5701_v7 = vld [vmem:[#allocation6 + $0x734] ss:$8 sps:$4 sm:$0xff]  }
 0x3f2   : > { %2969 = vmatpush1.bf16.msra.mxu1 %v5639_v21  ;;  %v2558_v37 = vsel %vm448_vm1, %v2553_v28, %v2557_v29  ;;  %v2373_v20 = vpack.c.bf16 %v6378_v55, %v2365_v17  ;;  %v5695_v21 = vld [vmem:[#allocation6 + $0x714] ss:$8 sps:$4 sm:$0xff]   ;;  %v5698_v24 = vld [vmem:[#allocation6 + $0x724] ss:$8 sps:$4 sm:$0xff]   ;;  %v5696_v25 = vld [vmem:[#allocation6 + $0x720] ss:$8 sps:$4 sm:$0xff]  }
 0x3f3   : > { %v2570_v35 = vsel %vm448_vm1, %v2565_v31, %v2569_v32  ;;  %3301 = vmatprep.subr.bf16.mxu1 %v5644_v27  ;;  %v5699_v26 = vld [vmem:[#allocation6 + $0x730] ss:$8 sps:$4 sm:$0xff]   ;;  %v5704_v27 = vld [vmem:[#allocation6 + $0x744] ss:$8 sps:$4 sm:$0xff]   ;;  %v5702_v28 = vld [vmem:[#allocation6 + $0x740] ss:$8 sps:$4 sm:$0xff]  }
 0x3f4   : > { %2970 = vmatprep.mubr.bf16.mxu1 %v2570_v35  ;;  %v5707_v29 = vld [vmem:[#allocation6 + $0x754] ss:$8 sps:$4 sm:$0xff]   ;;  %v5705_v31 = vld [vmem:[#allocation6 + $0x750] ss:$8 sps:$4 sm:$0xff]   ;;  %v5710_v32 = vld [vmem:[#allocation6 + $0x764] ss:$8 sps:$4 sm:$0xff]  }
 0x3f5   : > { %2971 = vmatmul.mubr.bf16.vlgmr.msra.gmra.mrb[8].mxu1 %v2558_v37  ;;  %v5711_v35 = vld [vmem:[#allocation6 + $0x770] ss:$8 sps:$4 sm:$0xff]   ;;  %v5714_v37 = vld [vmem:[#allocation6 + $0x780] ss:$8 sps:$4 sm:$0xff]   ;;  %v5842_v17 = vld [vmem:[#allocation8 + $0x244] ss:$16 sps:$4 sm:$0xff]  }
 0x3f6   : > { %3302 = vmatpush1.bf16.msra.mxu1 %v5642_v34  ;;  %3333 = vmatprep.mubr.bf16.mxu1 %v2374_v30  ;;  %v5713_v34 = vld [vmem:[#allocation6 + $0x774] ss:$8 sps:$4 sm:$0xff]   ;;  %v5744_v18 = vld [vmem:[#allocation6 + $0xa20] ss:$8 sps:$4 sm:$0xff]  }
 0x3f7   : > { %3303 = vmatprep.subr.bf16.mxu1 %v5647_v36  ;;  %v5716_v36 = vld [vmem:[#allocation6 + $0x784] ss:$8 sps:$4 sm:$0xff]   ;;  %v5719_v30 = vld [vmem:[#allocation6 + $0x794] ss:$8 sps:$4 sm:$0xff]  }
 0x3fa   : > { %3304 = vmatpush1.bf16.msra.mxu1 %v5645_v39  ;;  %v5717_v39 = vld [vmem:[#allocation6 + $0x790] ss:$8 sps:$4 sm:$0xff]  }
 0x3fb   : > { %3305 = vmatprep.subr.bf16.mxu1 %v5650_v40  ;;  %v5722_v40 = vld [vmem:[#allocation6 + $0x7a4] ss:$8 sps:$4 sm:$0xff]  }
 0x3fe   : > { %3306 = vmatpush1.bf16.msra.mxu1 %v5648_v43  ;;  %v5720_v43 = vld [vmem:[#allocation6 + $0x7a0] ss:$8 sps:$4 sm:$0xff]  }
 0x3ff   : > { %3307 = vmatprep.subr.bf16.mxu1 %v5653_v44  ;;  %v5725_v44 = vld [vmem:[#allocation6 + $0x7b4] ss:$8 sps:$4 sm:$0xff]  }
 0x402   : > { %3308 = vmatpush1.bf16.msra.mxu1 %v5651_v49  ;;  %v5723_v49 = vld [vmem:[#allocation6 + $0x7b0] ss:$8 sps:$4 sm:$0xff]  }
 0x403   : > { %3309 = vmatprep.subr.bf16.mxu1 %v5656_v47  ;;  %v5728_v47 = vld [vmem:[#allocation6 + $0x7c4] ss:$8 sps:$4 sm:$0xff]  }
 0x406   : > { %3310 = vmatpush1.bf16.msra.mxu1 %v5654_v48  ;;  %v5726_v48 = vld [vmem:[#allocation6 + $0x7c0] ss:$8 sps:$4 sm:$0xff]  }
 0x407   : > { %3311 = vmatprep.subr.bf16.mxu1 %v5659_v51  ;;  %v5731_v51 = vld [vmem:[#allocation6 + $0x7d4] ss:$8 sps:$4 sm:$0xff]  }
 0x40a   : > { %3312 = vmatpush1.bf16.msra.mxu1 %v5657_v52  ;;  %v5729_v52 = vld [vmem:[#allocation6 + $0x7d0] ss:$8 sps:$4 sm:$0xff]  }
 0x40b   : > { %3313 = vmatprep.subr.bf16.mxu1 %v5662_v53  ;;  %v5734_v53 = vld [vmem:[#allocation6 + $0x7e4] ss:$8 sps:$4 sm:$0xff]  }
 0x40e   : > { %3314 = vmatpush1.bf16.msra.mxu1 %v5660_v54  ;;  %v5732_v54 = vld [vmem:[#allocation6 + $0x7e0] ss:$8 sps:$4 sm:$0xff]  }
 0x40f   : > { %3315 = vmatprep.subr.bf16.mxu1 %v5665_v58  ;;  %v3392_v58 = vld [vmem:[#allocation2 + $0x48] sm:$0x3] }
 0x412   : > { %3316 = vmatpush1.bf16.msra.mxu1 %v5663_v59  ;;  %v5737_v59 = vld [vmem:[#allocation6 + $0x7f4] ss:$8 sps:$4 sm:$0xff]  }
 0x413   : > { %3317 = vmatprep.subr.bf16.mxu1 %v5668_v60  ;;  %v3388_v60 = vld [vmem:[#allocation2 + $0x8] sm:$0xfc] }
 0x416   : > { %3318 = vmatpush1.bf16.msra.mxu1 %v5666_v61  ;;  %v3400_v61 = vpack.c.bf16 %v3392_v58, %v3392_v58  ;;  %v5768_v58 = vld [vmem:[#allocation6 + $0xaa0] ss:$8 sps:$4 sm:$0xff]  }
 0x417   : > { %3319 = vmatprep.subr.bf16.mxu1 %v5671_v62  ;;  %v5735_v62 = vld [vmem:[#allocation6 + $0x7f0] ss:$8 sps:$4 sm:$0xff]  }
 0x41a   : > { %3320 = vmatpush1.bf16.msra.mxu1 %v5669_v63  ;;  %v5740_v63 = vld [vmem:[#allocation6 + $0xa04] ss:$8 sps:$4 sm:$0xff]  }
 0x41b   : > { %3321 = vmatprep.subr.bf16.mxu1 %v5674_v0  ;;  %v3396_v0 = vpack.c.bf16 %v6381_v56, %v3388_v60  ;;  %v5746_v56 = vld [vmem:[#allocation6 + $0xa24] ss:$8 sps:$4 sm:$0xff]   ;;  %v5864_v60 = vld [vmem:[#allocation8 + $0x340] ss:$16 sps:$4 sm:$0xff]  }
 0x41e   : > { %3322 = vmatpush1.bf16.msra.mxu1 %v5672_v1  ;;  %v2367_v1 = vld [vmem:[#allocation2 + $0x10] sm:$0xff] }
 0x41f   : > { %3323 = vmatprep.subr.bf16.mxu1 %v5677_v2  ;;  %v3480_v2 = vrot.slane %v3400_v61, 1  ;;  %v5869_v61 = vld [vmem:[#allocation8 + $0x364] ss:$16 sps:$4 sm:$0xff]  }
 0x422   : > { %3324 = vmatpush1.bf16.msra.mxu1 %v5675_v5  ;;  %v5738_v5 = vld [vmem:[#allocation6 + $0xa00] ss:$8 sps:$4 sm:$0xff]  }
 0x423   : > { %3325 = vmatprep.subr.bf16.mxu1 %v5680_v6  ;;  %v2375_v6 = vpack.c.bf16 %v6404_v3, %v2367_v1  ;;  %v5872_v1 = vld [vmem:[#allocation8 + $0x384] ss:$16 sps:$4 sm:$0xff]  }
 0x426   : > { %3326 = vmatpush1.bf16.msra.mxu1 %v5678_v8  ;;  %v3479_v8 = vrot.slane %v3396_v0, 1  ;;  %v5867_v0 = vld [vmem:[#allocation8 + $0x360] ss:$16 sps:$4 sm:$0xff]  }
 0x427   : > { %3327 = vmatprep.subr.bf16.mxu1 %v5683_v9  ;;  %v5743_v9 = vld [vmem:[#allocation6 + $0xa14] ss:$8 sps:$4 sm:$0xff]  }
 0x42a   : > { %3328 = vmatpush1.bf16.msra.mxu1 %v5681_v10  ;;  %v3481_v10 = vsel %vm1402_vm3, %v3479_v8, %v3480_v2  ;;  %v5774_v2 = vld [vmem:[#allocation6 + $0xac0] ss:$8 sps:$4 sm:$0xff]   ;;  %v5875_v8 = vld [vmem:[#allocation8 + $0x3a4] ss:$16 sps:$4 sm:$0xff]  }
 0x42b   : > { %3329 = vmatprep.subr.bf16.mxu1 %v5686_v11  ;;  %v5834_v11 = vld [vmem:[#allocation8 + $0x200] ss:$16 sps:$4 sm:$0xff]  }
 0x42e   : > { %3330 = vmatpush1.bf16.msra.mxu1 %v5684_v12  ;;  %v5836_v12 = vld [vmem:[#allocation8 + $0x204] ss:$16 sps:$4 sm:$0xff]  }
 0x42f   : > { %3331 = vmatprep.subr.bf16.mxu1 %v5689_v13  ;;  %v5741_v13 = vld [vmem:[#allocation6 + $0xa10] ss:$8 sps:$4 sm:$0xff]   ;;  %4293 = vmatprep.subr.bf16.mxu0 %v5836_v12  ;;  %v3391_v12 = vld [vmem:[#allocation2 + $0x40] sm:$0x3] }
 0x430   : > { %4294 = vmatpush1.bf16.msra.mxu0 %v5834_v11  ;;  %v5873_v11 = vld [vmem:[#allocation8 + $0x3a0] ss:$16 sps:$4 sm:$0xff]  }
 0x432   : > { %3332 = vmatpush1.bf16.msra.mxu1 %v5687_v15  ;;  %v5839_v15 = vld [vmem:[#allocation8 + $0x224] ss:$16 sps:$4 sm:$0xff]  }
 0x433   : > { %3344 = vmatprep.subr.bf16.mxu1 %v5692_v16  ;;  %v5837_v16 = vld [vmem:[#allocation8 + $0x220] ss:$16 sps:$4 sm:$0xff]   ;;  %4295 = vmatprep.subr.bf16.mxu0 %v5839_v15  ;;  %v3394_v15 = vld [vmem:[#allocation2 + $0x58] sm:$0x3] }
 0x434   : > { %4296 = vmatpush1.bf16.msra.mxu0 %v5837_v16  ;;  %v3387_v16 = vld [vmem:[#allocation2] sm:$0xfc] }
 0x435   : > { %3334 = vmatmul.mubr.bf16.vlgmr.msra.gmra.mrb[8].mxu1 %v2373_v20  ;;  %v5840_v20 = vld [vmem:[#allocation8 + $0x240] ss:$16 sps:$4 sm:$0xff]   ;;  %4297 = vmatprep.subr.bf16.mxu0 %v5842_v17  ;;  %v3399_v17 = vpack.c.bf16 %v3391_v12, %v3391_v12 }
 0x436   : > { %3345 = vmatpush1.bf16.msra.mxu1 %v5690_v19  ;;  %3376 = vmatprep.mubr.bf16.mxu1 %v2376_v22  ;;  %v5749_v19 = vld [vmem:[#allocation6 + $0xa34] ss:$8 sps:$4 sm:$0xff]   ;;  %v5747_v22 = vld [vmem:[#allocation6 + $0xa30] ss:$8 sps:$4 sm:$0xff]  }
 0x437   : > { %3346 = vmatprep.subr.bf16.mxu1 %v5695_v21  ;;  %v5845_v21 = vld [vmem:[#allocation8 + $0x264] ss:$16 sps:$4 sm:$0xff]  }
 0x438   : > { %4298 = vmatpush1.bf16.msra.mxu0 %v5840_v20  ;;  %v5783_v20 = vld [vmem:[#allocation6 + $0xaf0] ss:$8 sps:$4 sm:$0xff]  }
 0x439   : > { %4299 = vmatprep.subr.bf16.mxu0 %v5845_v21  ;;  %v3395_v21 = vpack.c.bf16 %v6378_v55, %v3387_v16  ;;  %v5789_v55 = vld [vmem:[#allocation6 + $0xb10] ss:$8 sps:$4 sm:$0xff]   ;;  %v5881_v16 = vld [vmem:[#allocation8 + $0x3e4] ss:$16 sps:$4 sm:$0xff]  }
 0x43a   : > { %3347 = vmatpush1.bf16.msra.mxu1 %v5693_v23  ;;  %v5752_v23 = vld [vmem:[#allocation6 + $0xa44] ss:$8 sps:$4 sm:$0xff]  }
 0x43b   : > { %3348 = vmatprep.subr.bf16.mxu1 %v5698_v24  ;;  %v5843_v24 = vld [vmem:[#allocation8 + $0x260] ss:$16 sps:$4 sm:$0xff]  }
 0x43c   : > { %4300 = vmatpush1.bf16.msra.mxu0 %v5843_v24  ;;  %v3477_v24 = vrot.slane %v3399_v17, 1  ;;  %v5884_v17 = vld [vmem:[#allocation8 + $0x20c] ss:$16 sps:$4 sm:$0xff]  }
 0x43e   : > { %3349 = vmatpush1.bf16.msra.mxu1 %v5696_v25  ;;  %v5848_v25 = vld [vmem:[#allocation8 + $0x284] ss:$16 sps:$4 sm:$0xff]  }
 0x43f   : > { %3350 = vmatprep.subr.bf16.mxu1 %v5701_v7  ;;  %v5750_v7 = vld [vmem:[#allocation6 + $0xa40] ss:$8 sps:$4 sm:$0xff]   ;;  %4301 = vmatprep.subr.bf16.mxu0 %v5848_v25 }
 0x442   : > { %3351 = vmatpush1.bf16.msra.mxu1 %v5699_v26  ;;  %v5755_v26 = vld [vmem:[#allocation6 + $0xa54] ss:$8 sps:$4 sm:$0xff]  }
 0x443   : > { %3352 = vmatprep.subr.bf16.mxu1 %v5704_v27  ;;  %v5846_v27 = vld [vmem:[#allocation8 + $0x280] ss:$16 sps:$4 sm:$0xff]  }
 0x444   : > { %4302 = vmatpush1.bf16.msra.mxu0 %v5846_v27 }
 0x446   : > { %3353 = vmatpush1.bf16.msra.mxu1 %v5702_v28  ;;  %v5851_v28 = vld [vmem:[#allocation8 + $0x2a4] ss:$16 sps:$4 sm:$0xff]  }
 0x447   : > { %3354 = vmatprep.subr.bf16.mxu1 %v5707_v29  ;;  %v5753_v29 = vld [vmem:[#allocation6 + $0xa50] ss:$8 sps:$4 sm:$0xff]   ;;  %4303 = vmatprep.subr.bf16.mxu0 %v5851_v28  ;;  %v5791_v28 = vld [vmem:[#allocation6 + $0xb14] ss:$8 sps:$4 sm:$0xff]  }
 0x44a   : > { %3355 = vmatpush1.bf16.msra.mxu1 %v5705_v31  ;;  %v5758_v31 = vld [vmem:[#allocation6 + $0xa64] ss:$8 sps:$4 sm:$0xff]  }
 0x44b   : > { %3356 = vmatprep.subr.bf16.mxu1 %v5710_v32  ;;  %v5849_v32 = vld [vmem:[#allocation8 + $0x2a0] ss:$16 sps:$4 sm:$0xff]  }
 0x44c   : > { %4304 = vmatpush1.bf16.msra.mxu0 %v5849_v32  ;;  %v5794_v32 = vld [vmem:[#allocation6 + $0xb24] ss:$8 sps:$4 sm:$0xff]  }
 0x44e   : > { %3357 = vmatpush1.bf16.msra.mxu1 %v5708_v33  ;;  %v5854_v33 = vld [vmem:[#allocation8 + $0x2c4] ss:$16 sps:$4 sm:$0xff]  }
 0x44f   : > { %3358 = vmatprep.subr.bf16.mxu1 %v5713_v34  ;;  %v5756_v34 = vld [vmem:[#allocation6 + $0xa60] ss:$8 sps:$4 sm:$0xff]   ;;  %4305 = vmatprep.subr.bf16.mxu0 %v5854_v33  ;;  %v5797_v33 = vld [vmem:[#allocation6 + $0xb34] ss:$8 sps:$4 sm:$0xff]  }
 0x452   : > { %3359 = vmatpush1.bf16.msra.mxu1 %v5711_v35  ;;  %v5761_v35 = vld [vmem:[#allocation6 + $0xa74] ss:$8 sps:$4 sm:$0xff]  }
 0x453   : > { %3360 = vmatprep.subr.bf16.mxu1 %v5716_v36  ;;  %v5852_v36 = vld [vmem:[#allocation8 + $0x2c0] ss:$16 sps:$4 sm:$0xff]  }
 0x454   : > { %4306 = vmatpush1.bf16.msra.mxu0 %v5852_v36  ;;  %v5798_v36 = vld [vmem:[#allocation6 + $0xb40] ss:$8 sps:$4 sm:$0xff]  }
 0x456   : > { %3361 = vmatpush1.bf16.msra.mxu1 %v5714_v37  ;;  %v5857_v37 = vld [vmem:[#allocation8 + $0x2e4] ss:$16 sps:$4 sm:$0xff]  }
 0x457   : > { %3362 = vmatprep.subr.bf16.mxu1 %v5719_v30  ;;  %v5759_v30 = vld [vmem:[#allocation6 + $0xa70] ss:$8 sps:$4 sm:$0xff]   ;;  %4307 = vmatprep.subr.bf16.mxu0 %v5857_v37  ;;  %v5803_v37 = vld [vmem:[#allocation6 + $0xb54] ss:$8 sps:$4 sm:$0xff]  }
 0x45a   : > { %3363 = vmatpush1.bf16.msra.mxu1 %v5717_v39  ;;  %v5764_v39 = vld [vmem:[#allocation6 + $0xa84] ss:$8 sps:$4 sm:$0xff]  }
 0x45b   : > { %3364 = vmatprep.subr.bf16.mxu1 %v5722_v40  ;;  %v5855_v40 = vld [vmem:[#allocation8 + $0x2e0] ss:$16 sps:$4 sm:$0xff]  }
 0x45c   : > { %4308 = vmatpush1.bf16.msra.mxu0 %v5855_v40  ;;  %v5804_v40 = vld [vmem:[#allocation6 + $0xb60] ss:$8 sps:$4 sm:$0xff]  }
 0x45e   : > { %3365 = vmatpush1.bf16.msra.mxu1 %v5720_v43  ;;  %v5860_v43 = vld [vmem:[#allocation8 + $0x304] ss:$16 sps:$4 sm:$0xff]  }
 0x45f   : > { %3366 = vmatprep.subr.bf16.mxu1 %v5725_v44  ;;  %v5762_v44 = vld [vmem:[#allocation6 + $0xa80] ss:$8 sps:$4 sm:$0xff]   ;;  %4309 = vmatprep.subr.bf16.mxu0 %v5860_v43  ;;  %v5809_v43 = vld [vmem:[#allocation6 + $0xb74] ss:$8 sps:$4 sm:$0xff]  }
 0x462   : > { %3367 = vmatpush1.bf16.msra.mxu1 %v5723_v49  ;;  %v5767_v49 = vld [vmem:[#allocation6 + $0xa94] ss:$8 sps:$4 sm:$0xff]  }
 0x463   : > { %3368 = vmatprep.subr.bf16.mxu1 %v5728_v47  ;;  %v5858_v47 = vld [vmem:[#allocation8 + $0x300] ss:$16 sps:$4 sm:$0xff]  }
 0x464   : > { %4310 = vmatpush1.bf16.msra.mxu0 %v5858_v47  ;;  %v5810_v47 = vld [vmem:[#allocation6 + $0xb80] ss:$8 sps:$4 sm:$0xff]  }
 0x466   : > { %3369 = vmatpush1.bf16.msra.mxu1 %v5726_v48  ;;  %v5863_v48 = vld [vmem:[#allocation8 + $0x324] ss:$16 sps:$4 sm:$0xff]  }
 0x467   : > { %3370 = vmatprep.subr.bf16.mxu1 %v5731_v51  ;;  %v5765_v51 = vld [vmem:[#allocation6 + $0xa90] ss:$8 sps:$4 sm:$0xff]   ;;  %4311 = vmatprep.subr.bf16.mxu0 %v5863_v48  ;;  %v5815_v48 = vld [vmem:[#allocation6 + $0xb94] ss:$8 sps:$4 sm:$0xff]  }
 0x46a   : > { %3371 = vmatpush1.bf16.msra.mxu1 %v5729_v52  ;;  %v5770_v52 = vld [vmem:[#allocation6 + $0xaa4] ss:$8 sps:$4 sm:$0xff]  }
 0x46b   : > { %3372 = vmatprep.subr.bf16.mxu1 %v5734_v53  ;;  %v5861_v53 = vld [vmem:[#allocation8 + $0x320] ss:$16 sps:$4 sm:$0xff]  }
 0x46c   : > { %4312 = vmatpush1.bf16.msra.mxu0 %v5861_v53  ;;  %v5816_v53 = vld [vmem:[#allocation6 + $0xba0] ss:$8 sps:$4 sm:$0xff]  }
 0x46e   : > { %3373 = vmatpush1.bf16.msra.mxu1 %v5732_v54  ;;  %v5866_v54 = vld [vmem:[#allocation8 + $0x344] ss:$16 sps:$4 sm:$0xff]  }
 0x46f   : > { %3374 = vmatprep.subr.bf16.mxu1 %v5737_v59  ;;  %v5773_v59 = vld [vmem:[#allocation6 + $0xab4] ss:$8 sps:$4 sm:$0xff]   ;;  %4313 = vmatprep.subr.bf16.mxu0 %v5866_v54 }
 0x470   : > { %4314 = vmatpush1.bf16.msra.mxu0 %v5864_v60  ;;  %v5821_v54 = vld [vmem:[#allocation6 + $0xbb4] ss:$8 sps:$4 sm:$0xff]   ;;  %v5822_v60 = vld [vmem:[#allocation6 + $0xbc0] ss:$8 sps:$4 sm:$0xff]  }
 0x471   : > { %4315 = vmatprep.subr.bf16.mxu0 %v5869_v61  ;;  %v5827_v61 = vld [vmem:[#allocation6 + $0xbd4] ss:$8 sps:$4 sm:$0xff]  }
 0x472   : > { %3375 = vmatpush1.bf16.msra.mxu1 %v5735_v62  ;;  %v5771_v62 = vld [vmem:[#allocation6 + $0xab0] ss:$8 sps:$4 sm:$0xff]  }
 0x473   : > { %3812 = vmatprep.subr.bf16.mxu1 %v5740_v63  ;;  %v5776_v63 = vld [vmem:[#allocation6 + $0xac4] ss:$8 sps:$4 sm:$0xff]  }
 0x474   : > { %4316 = vmatpush1.bf16.msra.mxu0 %v5867_v0  ;;  %v3393_v0 = vld [vmem:[#allocation2 + $0x50] sm:$0x3] }
 0x475   : > { %3377 = vmatmul.mubr.bf16.vlgmr.msra.gmra.mrb[8].mxu1 %v2375_v6  ;;  %v5870_v6 = vld [vmem:[#allocation8 + $0x380] ss:$16 sps:$4 sm:$0xff]   ;;  %4317 = vmatprep.subr.bf16.mxu0 %v5872_v1 }
 0x476   : > { %3813 = vmatpush1.bf16.msra.mxu1 %v5738_v5  ;;  %3844 = vmatprep.mubr.bf16.mxu1 %v3481_v10  ;;  %v5779_v5 = vld [vmem:[#allocation6 + $0xad4] ss:$8 sps:$4 sm:$0xff]   ;;  %v5782_v10 = vld [vmem:[#allocation6 + $0xae4] ss:$8 sps:$4 sm:$0xff]   ;;  %v5828_v1 = vld [vmem:[#allocation6 + $0xbe0] ss:$8 sps:$4 sm:$0xff]  }
 0x477   : > { %3814 = vmatprep.subr.bf16.mxu1 %v5743_v9  ;;  %v5777_v9 = vld [vmem:[#allocation6 + $0xad0] ss:$8 sps:$4 sm:$0xff]  }
 0x478   : > { %4318 = vmatpush1.bf16.msra.mxu0 %v5870_v6  ;;  %v3401_v6 = vpack.c.bf16 %v3393_v0, %v3393_v0 }
 0x479   : > { %4319 = vmatprep.subr.bf16.mxu0 %v5875_v8  ;;  %v5831_v8 = vld [vmem:[#allocation6 + $0xbf0] ss:$8 sps:$4 sm:$0xff]  }
 0x47a   : > { %3815 = vmatpush1.bf16.msra.mxu1 %v5741_v13  ;;  %v5780_v13 = vld [vmem:[#allocation6 + $0xae0] ss:$8 sps:$4 sm:$0xff]  }
 0x47b   : > { %3816 = vmatprep.subr.bf16.mxu1 %v5746_v56  ;;  %v5785_v56 = vld [vmem:[#allocation6 + $0xaf4] ss:$8 sps:$4 sm:$0xff]  }
 0x47c   : > { %4320 = vmatpush1.bf16.msra.mxu0 %v5873_v11 }
 0x47e   : > { %3817 = vmatpush1.bf16.msra.mxu1 %v5744_v18  ;;  %v3390_v18 = vld [vmem:[#allocation2 + $0x18] sm:$0xfc] }
 0x47f   : > { %3818 = vmatprep.subr.bf16.mxu1 %v5749_v19  ;;  %v3402_v19 = vpack.c.bf16 %v3394_v15, %v3394_v15  ;;  %v5878_v15 = vld [vmem:[#allocation8 + $0x3c4] ss:$16 sps:$4 sm:$0xff]  }
 0x480   : > { %4321 = vmatprep.subr.bf16.mxu0 %v5878_v15 }
 0x481   : > { %v3486_v25 = vrot.slane %v3402_v19, 1 }
 0x482   : > { %3819 = vmatpush1.bf16.msra.mxu1 %v5747_v22  ;;  %v5788_v22 = vld [vmem:[#allocation6 + $0xb04] ss:$8 sps:$4 sm:$0xff]  }
 0x483   : > { %3820 = vmatprep.subr.bf16.mxu1 %v5752_v23  ;;  %v3398_v23 = vpack.c.bf16 %v6407_v4, %v3390_v18  ;;  %v5792_v4 = vld [vmem:[#allocation6 + $0xb20] ss:$8 sps:$4 sm:$0xff]  }
 0x485   : > { %v3485_v27 = vrot.slane %v3398_v23, 1 }
 0x486   : > { %3821 = vmatpush1.bf16.msra.mxu1 %v5750_v7  ;;  %v3476_v7 = vrot.slane %v3395_v21, 1 }
 0x487   : > { %3822 = vmatprep.subr.bf16.mxu1 %v5755_v26  ;;  %v5786_v26 = vld [vmem:[#allocation6 + $0xb00] ss:$8 sps:$4 sm:$0xff]  }
 0x48a   : > { %3823 = vmatpush1.bf16.msra.mxu1 %v5753_v29  ;;  %v3478_v29 = vsel %vm1402_vm3, %v3476_v7, %v3477_v24 }
 0x48b   : > { %3824 = vmatprep.subr.bf16.mxu1 %v5758_v31  ;;  %v3487_v31 = vsel %vm1402_vm3, %v3485_v27, %v3486_v25  ;;  %v5887_v27 = vld [vmem:[#allocation8 + $0x22c] ss:$16 sps:$4 sm:$0xff]  }
 0x48e   : > { %3825 = vmatpush1.bf16.msra.mxu1 %v5756_v34  ;;  %v5795_v34 = vld [vmem:[#allocation6 + $0xb30] ss:$8 sps:$4 sm:$0xff]  }
 0x48f   : > { %3826 = vmatprep.subr.bf16.mxu1 %v5761_v35  ;;  %v5800_v35 = vld [vmem:[#allocation6 + $0xb44] ss:$8 sps:$4 sm:$0xff]  }
 0x492   : > { %3827 = vmatpush1.bf16.msra.mxu1 %v5759_v30  ;;  %v5801_v30 = vld [vmem:[#allocation6 + $0xb50] ss:$8 sps:$4 sm:$0xff]  }
 0x493   : > { %3828 = vmatprep.subr.bf16.mxu1 %v5764_v39  ;;  %v5806_v39 = vld [vmem:[#allocation6 + $0xb64] ss:$8 sps:$4 sm:$0xff]  }
 0x496   : > { %3829 = vmatpush1.bf16.msra.mxu1 %v5762_v44  ;;  %v5807_v44 = vld [vmem:[#allocation6 + $0xb70] ss:$8 sps:$4 sm:$0xff]  }
 0x497   : > { %3830 = vmatprep.subr.bf16.mxu1 %v5767_v49  ;;  %v5812_v49 = vld [vmem:[#allocation6 + $0xb84] ss:$8 sps:$4 sm:$0xff]  }
 0x49a   : > { %3831 = vmatpush1.bf16.msra.mxu1 %v5765_v51  ;;  %v5813_v51 = vld [vmem:[#allocation6 + $0xb90] ss:$8 sps:$4 sm:$0xff]  }
 0x49b   : > { %3832 = vmatprep.subr.bf16.mxu1 %v5770_v52  ;;  %v5818_v52 = vld [vmem:[#allocation6 + $0xba4] ss:$8 sps:$4 sm:$0xff]  }
 0x49e   : > { %3833 = vmatpush1.bf16.msra.mxu1 %v5768_v58  ;;  %v5819_v58 = vld [vmem:[#allocation6 + $0xbb0] ss:$8 sps:$4 sm:$0xff]  }
 0x49f   : > { %3834 = vmatprep.subr.bf16.mxu1 %v5773_v59  ;;  %v5824_v59 = vld [vmem:[#allocation6 + $0xbc4] ss:$8 sps:$4 sm:$0xff]  }
 0x4a2   : > { %3835 = vmatpush1.bf16.msra.mxu1 %v5771_v62  ;;  %v5825_v62 = vld [vmem:[#allocation6 + $0xbd0] ss:$8 sps:$4 sm:$0xff]  }
 0x4a3   : > { %3836 = vmatprep.subr.bf16.mxu1 %v5776_v63  ;;  %v5830_v63 = vld [vmem:[#allocation6 + $0xbe4] ss:$8 sps:$4 sm:$0xff]  }
 0x4a6   : > { %3837 = vmatpush1.bf16.msra.mxu1 %v5774_v2  ;;  %v5833_v2 = vld [vmem:[#allocation6 + $0xbf4] ss:$8 sps:$4 sm:$0xff]  }
 0x4a7   : > { %3838 = vmatprep.subr.bf16.mxu1 %v5779_v5  ;;  %v3389_v5 = vld [vmem:[#allocation2 + $0x10] sm:$0xfc] }
 0x4aa   : > { %3839 = vmatpush1.bf16.msra.mxu1 %v5777_v9  ;;  %v3397_v9 = vpack.c.bf16 %v6404_v3, %v3389_v5 }
 0x4ab   : > { %3840 = vmatprep.subr.bf16.mxu1 %v5782_v10  ;;  %v3483_v10 = vrot.slane %v3401_v6, 1 }
 0x4ac   : > { %v3482_v11 = vrot.slane %v3397_v9, 1 }
 0x4ae   : > { %3841 = vmatpush1.bf16.msra.mxu1 %v5780_v13  ;;  %v3484_v12 = vsel %vm1402_vm3, %v3482_v11, %v3483_v10  ;;  %v5876_v13 = vld [vmem:[#allocation8 + $0x3c0] ss:$16 sps:$4 sm:$0xff]  }
 0x4af   : > { %3842 = vmatprep.subr.bf16.mxu1 %v5785_v56  ;;  %4322 = vmatpush1.bf16.msra.mxu0 %v5876_v13  ;;  %v5879_v56 = vld [vmem:[#allocation8 + $0x3e0] ss:$16 sps:$4 sm:$0xff]  }
 0x4b0   : > { %4323 = vmatprep.subr.bf16.mxu0 %v5881_v16 }
 0x4b2   : > { %3843 = vmatpush1.bf16.msra.mxu1 %v5783_v20 }
 0x4b3   : > { %3855 = vmatprep.subr.bf16.mxu1 %v5788_v22  ;;  %4324 = vmatpush1.bf16.msra.mxu0 %v5879_v56 }
 0x4b4   : > { %4336 = vmatprep.subr.bf16.mxu0 %v5884_v17 }
 0x4b5   : > { %3845 = vmatmul.mubr.bf16.vlgmr.msra.gmra.mrb[8].mxu1 %v3478_v29  ;;  %v5890_v29 = vld [vmem:[#allocation8 + $0x24c] ss:$16 sps:$4 sm:$0xff]  }
 0x4b6   : > { %3856 = vmatpush1.bf16.msra.mxu1 %v5786_v26  ;;  %3887 = vmatprep.mubr.bf16.mxu1 %v3487_v31  ;;  %v5882_v26 = vld [vmem:[#allocation8 + $0x208] ss:$16 sps:$4 sm:$0xff]  }
 0x4b7   : > { %3857 = vmatprep.subr.bf16.mxu1 %v5791_v28  ;;  %v5885_v28 = vld [vmem:[#allocation8 + $0x228] ss:$16 sps:$4 sm:$0xff]  }
 0x4b8   : > { %v5888_v31 = vld [vmem:[#allocation8 + $0x248] ss:$16 sps:$4 sm:$0xff]  }
 0x4ba   : > { %3858 = vmatpush1.bf16.msra.mxu1 %v5789_v55  ;;  %v5893_v55 = vld [vmem:[#allocation8 + $0x26c] ss:$16 sps:$4 sm:$0xff]  }
 0x4bb   : > { %3859 = vmatprep.subr.bf16.mxu1 %v5794_v32  ;;  %v5891_v32 = vld [vmem:[#allocation8 + $0x268] ss:$16 sps:$4 sm:$0xff]  }
 0x4be   : > { %3860 = vmatpush1.bf16.msra.mxu1 %v5792_v4  ;;  %v5896_v4 = vld [vmem:[#allocation8 + $0x28c] ss:$16 sps:$4 sm:$0xff]  }
 0x4bf   : > { %3861 = vmatprep.subr.bf16.mxu1 %v5797_v33  ;;  %v5894_v33 = vld [vmem:[#allocation8 + $0x288] ss:$16 sps:$4 sm:$0xff]  }
 0x4c2   : > { %3862 = vmatpush1.bf16.msra.mxu1 %v5795_v34  ;;  %v5899_v34 = vld [vmem:[#allocation8 + $0x2ac] ss:$16 sps:$4 sm:$0xff]  }
 0x4c3   : > { %3863 = vmatprep.subr.bf16.mxu1 %v5800_v35  ;;  %v5897_v35 = vld [vmem:[#allocation8 + $0x2a8] ss:$16 sps:$4 sm:$0xff]  }
 0x4c6   : > { %3864 = vmatpush1.bf16.msra.mxu1 %v5798_v36  ;;  %v5902_v36 = vld [vmem:[#allocation8 + $0x2cc] ss:$16 sps:$4 sm:$0xff]  }
 0x4c7   : > { %3865 = vmatprep.subr.bf16.mxu1 %v5803_v37  ;;  %v5900_v37 = vld [vmem:[#allocation8 + $0x2c8] ss:$16 sps:$4 sm:$0xff]  }
 0x4ca   : > { %3866 = vmatpush1.bf16.msra.mxu1 %v5801_v30  ;;  %v5905_v30 = vld [vmem:[#allocation8 + $0x2ec] ss:$16 sps:$4 sm:$0xff]  }
 0x4cb   : > { %3867 = vmatprep.subr.bf16.mxu1 %v5806_v39  ;;  %v5903_v39 = vld [vmem:[#allocation8 + $0x2e8] ss:$16 sps:$4 sm:$0xff]  }
 0x4ce   : > { %3868 = vmatpush1.bf16.msra.mxu1 %v5804_v40  ;;  %v5908_v40 = vld [vmem:[#allocation8 + $0x30c] ss:$16 sps:$4 sm:$0xff]  }
 0x4cf   : > { %3869 = vmatprep.subr.bf16.mxu1 %v5809_v43  ;;  %v5906_v43 = vld [vmem:[#allocation8 + $0x308] ss:$16 sps:$4 sm:$0xff]  }
 0x4d2   : > { %3870 = vmatpush1.bf16.msra.mxu1 %v5807_v44  ;;  %v5911_v44 = vld [vmem:[#allocation8 + $0x32c] ss:$16 sps:$4 sm:$0xff]  }
 0x4d3   : > { %3871 = vmatprep.subr.bf16.mxu1 %v5812_v49  ;;  %v5909_v49 = vld [vmem:[#allocation8 + $0x328] ss:$16 sps:$4 sm:$0xff]  }
 0x4d6   : > { %3872 = vmatpush1.bf16.msra.mxu1 %v5810_v47  ;;  %v5914_v47 = vld [vmem:[#allocation8 + $0x34c] ss:$16 sps:$4 sm:$0xff]  }
 0x4d7   : > { %3873 = vmatprep.subr.bf16.mxu1 %v5815_v48  ;;  %v5912_v48 = vld [vmem:[#allocation8 + $0x348] ss:$16 sps:$4 sm:$0xff]  }
 0x4da   : > { %3874 = vmatpush1.bf16.msra.mxu1 %v5813_v51  ;;  %v5917_v51 = vld [vmem:[#allocation8 + $0x36c] ss:$16 sps:$4 sm:$0xff]  }
 0x4db   : > { %3875 = vmatprep.subr.bf16.mxu1 %v5818_v52  ;;  %v5915_v52 = vld [vmem:[#allocation8 + $0x368] ss:$16 sps:$4 sm:$0xff]  }
 0x4de   : > { %3876 = vmatpush1.bf16.msra.mxu1 %v5816_v53  ;;  %v5920_v53 = vld [vmem:[#allocation8 + $0x38c] ss:$16 sps:$4 sm:$0xff]  }
 0x4df   : > { %3877 = vmatprep.subr.bf16.mxu1 %v5821_v54  ;;  %v5918_v54 = vld [vmem:[#allocation8 + $0x388] ss:$16 sps:$4 sm:$0xff]  }
 0x4e2   : > { %3878 = vmatpush1.bf16.msra.mxu1 %v5819_v58  ;;  %v5923_v58 = vld [vmem:[#allocation8 + $0x3ac] ss:$16 sps:$4 sm:$0xff]  }
 0x4e3   : > { %3879 = vmatprep.subr.bf16.mxu1 %v5824_v59  ;;  %v5921_v59 = vld [vmem:[#allocation8 + $0x3a8] ss:$16 sps:$4 sm:$0xff]  }
 0x4e6   : > { %3880 = vmatpush1.bf16.msra.mxu1 %v5822_v60  ;;  %v5926_v60 = vld [vmem:[#allocation8 + $0x3cc] ss:$16 sps:$4 sm:$0xff]  }
 0x4e7   : > { %3881 = vmatprep.subr.bf16.mxu1 %v5827_v61  ;;  %v5924_v61 = vld [vmem:[#allocation8 + $0x3c8] ss:$16 sps:$4 sm:$0xff]  }
 0x4ea   : > { %3882 = vmatpush1.bf16.msra.mxu1 %v5825_v62  ;;  %v5929_v62 = vld [vmem:[#allocation8 + $0x3ec] ss:$16 sps:$4 sm:$0xff]  }
 0x4eb   : > { %3883 = vmatprep.subr.bf16.mxu1 %v5830_v63  ;;  %v5927_v63 = vld [vmem:[#allocation8 + $0x3e8] ss:$16 sps:$4 sm:$0xff]  }
 0x4ee   : > { %3884 = vmatpush1.bf16.msra.mxu1 %v5828_v1 }
 0x4ef   : > { %3885 = vmatprep.subr.bf16.mxu1 %v5833_v2 }
 0x4f2   : > { %3886 = vmatpush1.bf16.msra.mxu1 %v5831_v8 }
 0x4f5   : > { %3888 = vmatmul.mubr.bf16.vlgmr.msra.gmra.mrb[8].mxu1 %v3484_v12 }
 0x5c8   : > { %v3889_v18 = vpop.f32.mrb[8].mxu1 }
 0x5c9   : > { %v3891_v19 = vpop.f32.mrb[9].mxu1  ;;  %v3902_v20 = vmax.f32 %v3889_v18, 0.0 }
 0x5ca   : > { %v3893_v3 = vpop.f32.mrb[10].mxu1  ;;  %v3903_v23 = vmax.f32 %v3891_v19, 0.0 }
 0x5cb   : > { %v3904_v21 = vmax.f32 %v3893_v3, 0.0  ;;  %v3895_v22 = vpop.f32.mrb[11].mxu1 }
 0x5cc   : > { %v3905_v24 = vmax.f32 %v3895_v22, 0.0 }
 0x5cd   : > { %v6425_v25 = vpack.c.bf16 %v3904_v21, %v3902_v20 }
 0x5ce   : > { %v3907_v7 = vpack.c.bf16 %v3905_v24, %v3903_v23 }
 0x5d0   : > { %4325 = vmatprep.mubr.bf16.mxu0 %v3907_v7 }
 0x5d1   : > { %4326 = vmatmul.mubr.bf16.vlgmr.msra.gmra.mrb[4].mxu0 %v6425_v25 }
 0x5d2   : > { %4337 = vmatpush1.bf16.msra.mxu0 %v5882_v26  ;;  %4368 = vmatprep.mubr.bf16.mxu0 %v3907_v7 }
 0x5d3   : > { %4338 = vmatprep.subr.bf16.mxu0 %v5887_v27 }
 0x5d6   : > { %4339 = vmatpush1.bf16.msra.mxu0 %v5885_v28 }
 0x5d7   : > { %4340 = vmatprep.subr.bf16.mxu0 %v5890_v29 }
 0x5da   : > { %4341 = vmatpush1.bf16.msra.mxu0 %v5888_v31 }
 0x5db   : > { %4342 = vmatprep.subr.bf16.mxu0 %v5893_v55 }
 0x5de   : > { %4343 = vmatpush1.bf16.msra.mxu0 %v5891_v32 }
 0x5df   : > { %4344 = vmatprep.subr.bf16.mxu0 %v5896_v4 }
 0x5e2   : > { %4345 = vmatpush1.bf16.msra.mxu0 %v5894_v33 }
 0x5e3   : > { %4346 = vmatprep.subr.bf16.mxu0 %v5899_v34 }
 0x5e6   : > { %4347 = vmatpush1.bf16.msra.mxu0 %v5897_v35 }
 0x5e7   : > { %4348 = vmatprep.subr.bf16.mxu0 %v5902_v36 }
 0x5ea   : > { %4349 = vmatpush1.bf16.msra.mxu0 %v5900_v37 }
 0x5eb   : > { %4350 = vmatprep.subr.bf16.mxu0 %v5905_v30 }
 0x5ee   : > { %4351 = vmatpush1.bf16.msra.mxu0 %v5903_v39 }
 0x5ef   : > { %4352 = vmatprep.subr.bf16.mxu0 %v5908_v40 }
 0x5f2   : > { %4353 = vmatpush1.bf16.msra.mxu0 %v5906_v43 }
 0x5f3   : > { %4354 = vmatprep.subr.bf16.mxu0 %v5911_v44 }
 0x5f6   : > { %4355 = vmatpush1.bf16.msra.mxu0 %v5909_v49 }
 0x5f7   : > { %4356 = vmatprep.subr.bf16.mxu0 %v5914_v47 }
 0x5fa   : > { %4357 = vmatpush1.bf16.msra.mxu0 %v5912_v48 }
 0x5fb   : > { %4358 = vmatprep.subr.bf16.mxu0 %v5917_v51 }
 0x5fe   : > { %4359 = vmatpush1.bf16.msra.mxu0 %v5915_v52 }
 0x5ff   : > { %4360 = vmatprep.subr.bf16.mxu0 %v5920_v53 }
 0x602   : > { %4361 = vmatpush1.bf16.msra.mxu0 %v5918_v54 }
 0x603   : > { %4362 = vmatprep.subr.bf16.mxu0 %v5923_v58 }
 0x606   : > { %4363 = vmatpush1.bf16.msra.mxu0 %v5921_v59 }
 0x607   : > { %4364 = vmatprep.subr.bf16.mxu0 %v5926_v60 }
 0x60a   : > { %4365 = vmatpush1.bf16.msra.mxu0 %v5924_v61 }
 0x60b   : > { %4366 = vmatprep.subr.bf16.mxu0 %v5929_v62 }
 0x60e   : > { %4367 = vmatpush1.bf16.msra.mxu0 %v5927_v63 }
 0x611   : > { %4369 = vmatmul.mubr.bf16.vlgmr.msra.gmra.mrb[8].mxu0 %v6425_v25 }
 0x6a4   : > { %v4327_v0 = vpop.f32.mrb[4].mxu0 }
 0x6a5   : > { %v4379_v1 = vadd.f32 %v4327_v0, %v6362_v38  ;;  %v4329_v2 = vpop.f32.mrb[5].mxu0 }
 0x6a6   : > { %v4380_v5 = vadd.f32 %v4329_v2, %v6365_v41  ;;  %v4331_v6 = vpop.f32.mrb[6].mxu0 }
 0x6a7   : > { %v4387_v8 = vmax.f32 %v4379_v1, 0.0  ;;  %v4383_v9 = vadd.f32 %v4331_v6, %v6369_v45  ;;  %v4333_v10 = vpop.f32.mrb[7].mxu0 }
 0x6a8   : > { %v4388_v11 = vmax.f32 %v4380_v5, 0.0  ;;  %v4384_v12 = vadd.f32 %v4333_v10, %v6373_v14 }
 0x6a9   : > { %4395 = vst [vmem:[%s218_s18] sm:$0xff] %v4387_v8  ;;  %v4391_v13 = vmax.f32 %v4383_v9, 0.0 }
 0x6aa   : > { %4396 = vst [vmem:[%s218_s18 + $0x8] sm:$0xff] %v4388_v11  ;;  %v4392_v15 = vmax.f32 %v4384_v12, 0.0 }
 0x6ab   : > { %4399 = vst [vmem:[%s218_s18 + $0x20] sm:$0xff] %v4391_v13 }
 0x6ac   : > { %4400 = vst [vmem:[%s218_s18 + $0x28] sm:$0xff] %v4392_v15 }
 0x6e4   : > { %v4370_v38 = vpop.f32.mrb[8].mxu0 }
 0x6e5   : > { %v4381_v41 = vadd.f32 %v4370_v38, %v6388_v42  ;;  %v4372_v56 = vpop.f32.mrb[9].mxu0 }
 0x6e6   : > { %v4382_v45 = vadd.f32 %v4372_v56, %v6391_v46  ;;  %v4374_v16 = vpop.f32.mrb[10].mxu0 }
 0x6e7   : > { %v4389_v17 = vmax.f32 %v4381_v41, 0.0  ;;  %v4385_v14 = vadd.f32 %v4374_v16, %v6395_v50  ;;  %v4376_v18 = vpop.f32.mrb[11].mxu0 }
 0x6e8   : > { %v4390_v19 = vmax.f32 %v4382_v45, 0.0  ;;  %v4386_v3 = vadd.f32 %v4376_v18, %v6399_v57 }
 0x6e9   : > { %4397 = vst [vmem:[%s218_s18 + $0x10] sm:$0xff] %v4389_v17  ;;  %v4393_v42 = vmax.f32 %v4385_v14, 0.0 }
 0x6ea   : > { %4398 = vst [vmem:[%s218_s18 + $0x18] sm:$0xff] %v4390_v19  ;;  %v4394_v46 = vmax.f32 %v4386_v3, 0.0 }
 0x6eb   : > { %4401 = vst [vmem:[%s218_s18 + $0x30] sm:$0xff] %v4393_v42 }
 0x6ec   : > { %4402 = vst [vmem:[%s218_s18 + $0x38] sm:$0xff] %v4394_v46 }
 0x6ed   : > { %6037 = shalt.err (!%p6034_p2)
}
 0x6ee   : > { %s6038_s25 = scalar_lea.hbm %s6445_s22, 1024  ;;  %s6042_s26 = scalar_lea.hbm %s6492_s3, 2048 }
 0x6ef   : > { %p6039_p13 = scmp.ne.s32.totalorder %s6445_s22, %s6038_s25  ;;  %p6043_p4 = scmp.lt.u32.totalorder %s6445_s22, %s6492_s3 }
 0x6f0   : > { %p6044_p7 = scmp.lt.u32.totalorder %s6042_s26, %s6038_s25  ;;  %p6046_p11 = scmp.lt.u32.totalorder %s6038_s25, %s6445_s22 }
 0x6f1   : > { %p6040_p6 = pnand %p6039_p13, %p6506_p0 }
 0x6f2   : > { %p6045_p8 = por %p6044_p7, %p6043_p4 }
 0x6f3   : > { %p6041_p10 = pneg %p6040_p6 }
 0x6f4   : > { %p6047_p1 = por %p6046_p11, %p6045_p8 }
 0x6f6   : > { %p6048_p3 = pnand %p6047_p1, %p6041_p10 }
 0x6f8   : > { %6051 = shalt.err (!%p6048_p3)
}
 0x6f9   : > { %s6107_s5 = smov 512   ;;  %s6108_s18 = smov 32  }
 0x6fa   : > { %5096 = dma.vmem_to_hbm [thread:$0]  (%p6506_p0), %s6439_s20, 1024, %s6445_s22, %s4404_s16, %s6107_s5, %s6107_s5, %s6108_s18  }
 0x6fb PF: > { %s4433_s24 = sand.u32 1, %s6082_s12   ;;  %p6507_p5 = scmp.ne.s32.totalorder %s6497_s19, 0 }
 0x6fc   : > { %p6508_p9 = scmp.ge.s32.totalorder %s6094_s15, 2  ;;  %s4434_s27 = scalar_lea.sflag [#allocation5], %s4433_s24 }
 0x6fe   : > { %p5110_p12 = pnand %p6508_p9, %p6507_p5 }
 0x700   : > { %6077 = dma.done.wait (!%p5110_p12), %s4434_s27, 1024  }
 0x701   : > { %6079 = vsyncadd (!%p5110_p12), %s4434_s27, 4294966272  ;;  %p17_p2 = scmp.ge.s32.totalorder %s6239_s6, 4   ;;  %s6509_s12 = smov %s6086_s13 }
 0x702   : > { %s6510_s13 = smov %s6090_s14  ;;  %s6511_s14 = smov %s6248_s9 }
 0x703   : > { %s6512_s15 = smov %s6239_s6  ;;  %19 = sbr.rel (!%p17_p2) target bundleno = 6 (0x6), region = 92 }
 0x70a   :  { %4439 = vsyncpa [#allocation4], 1 }
 0x70b   :  { %4441 = vsyncpa [#allocation4 + $0x1], 1 }
 0x70c   :  { %4442 = vsyncpa [#allocation7], 1 }
 0x70d   :  { %4443 = vsyncpa [#allocation5], 1 }
 0x70e   :  { %4445 = vsyncpa [#allocation5 + $0x1], 1 }

</bundles_post_ra>
